<compile_context>
chip_gen: v6e
topology: v6e:2x2x1
jax: 0.10.0
libtpu: 0.0.40
codegen_flags: <defaults>
</compile_context>

<pallas_src>
import jax
import jax.numpy as jnp
from jax.experimental import pallas as pl
from jax.experimental.pallas import tpu as pltpu


TILE_B = 4096  # batch tile on the 128-lane axis (multiple of 512)


# ----------------------------------------------------------------------------
# Fused kernel.  All operands transposed: [features, batch_tile].
#   idx_ref   : (1, TILE_B) int32   -- link index per batch element (streamed)
#   xl_ref    : (2F+S, L)   f32     -- per-link feature table (resident)
#   w_ref     : (SD+H2, 2F+S) f32   -- folded (lin1+lin2+bn2 | sg_lin+bn1)
#   b_ref     : (SD+H2, 1)  f32
#   whead_ref : (SD+H2, 1)  f32     -- output Linear(SD+H2 -> 1) weight
#   bhead_ref : (1, 1)      f32
#   out_ref   : (1, TILE_B) f32     -- sigmoid scores (lane-dense)
# ----------------------------------------------------------------------------
def fused_link_mlp_kernel(idx_ref, xl_ref, w_ref, b_ref, whead_ref, bhead_ref,
                          out_ref):
    num_links = xl_ref.shape[1]
    tile_b = idx_ref.shape[1]

    # In-kernel gather: one-hot over link ids (MXU), exact column selection.
    onehot = (jax.lax.broadcasted_iota(jnp.int32, (num_links, tile_b), 0)
              == idx_ref[...]).astype(jnp.float32)               # (L, T)
    xall = jnp.dot(xl_ref[...], onehot,
                   preferred_element_type=jnp.float32)            # (2F+S, T)

    # Folded linears + BatchNorms, then ReLU (dropout = identity at eval).
    # Rows [:SD] = subgraph branch, rows [SD:] = node-feature branch.
    h = jnp.maximum(
        jnp.dot(w_ref[...], xall, preferred_element_type=jnp.float32)
        + b_ref[...],
        0.0)                                                      # (SD+H2, T)

    # Head Linear(SD+H2 -> 1): VPU multiply + XLU sublane reduce (no N=1 MXU
    # matmul, no lane-width-1 masked stores).
    z = jnp.sum(h * whead_ref[...], axis=0, keepdims=True) + bhead_ref[...]
    out_ref[...] = pl.reciprocal(1.0 + jnp.exp(-z))               # sigmoid


# ----------------------------------------------------------------------------
# Wrapper: build the tiny per-link table (O(num_links), pure data movement),
# pad the index row to a tile multiple, run the gridded pallas_call.
# ----------------------------------------------------------------------------
@jax.jit
def model_forward(data_x, subgraph_features, links, sample_indices, indices,
                  folded):
    B = indices.shape[0]
    num_tiles = pl.cdiv(B, TILE_B)
    b_pad = num_tiles * TILE_B

    # Per-link feature table (no batch scaling): for link row l the model
    # consumes [data_x[links[l,0]], data_x[links[l,1]], sf[sample_indices[l]]].
    dx = data_x.astype(jnp.float32)
    sgf = subgraph_features.astype(jnp.float32)
    lnk = links.astype(jnp.int32)
    x0_l = dx[lnk[:, 0]]                                   # (L, F)
    x1_l = dx[lnk[:, 1]]                                   # (L, F)
    sf_l = sgf[sample_indices.astype(jnp.int32)]           # (L, S)
    xl_t = jnp.concatenate([x0_l, x1_l, sf_l], axis=1).T   # (2F+S, L)

    # Streamed per-batch index row; padded lanes (index 0) are sliced off.
    idx_row = jnp.pad(indices.astype(jnp.int32), (0, b_pad - B))[None, :]

    C, L = xl_t.shape
    HD = folded["w_all"].shape[0]

    def tile_map(i):
        return (0, i)

    def const_map(i):
        return (0, 0)

    out_row = pl.pallas_call(
        fused_link_mlp_kernel,
        out_shape=jax.ShapeDtypeStruct((1, b_pad), jnp.float32),
        grid=(num_tiles,),
        in_specs=[
            pl.BlockSpec((1, TILE_B), tile_map),   # idx_row (only streamed op)
            pl.BlockSpec((C, L), const_map),       # per-link feature table
            pl.BlockSpec((HD, C), const_map),      # folded weight
            pl.BlockSpec((HD, 1), const_map),      # folded bias
            pl.BlockSpec((HD, 1), const_map),      # head weight
            pl.BlockSpec((1, 1), const_map),       # head bias
        ],
        out_specs=pl.BlockSpec((1, TILE_B), tile_map),
        compiler_params=pltpu.CompilerParams(
            dimension_semantics=("parallel",)),    # megacore on v7x
    )(idx_row, xl_t, folded["w_all"], folded["b_all"],
      folded["w_head"], folded["b_head"])

    return out_row[0, :B, None]                    # (B, 1)


# ----------------------------------------------------------------------------
# Raw (PyTorch-like) parameters and the eval-time folding.
# ----------------------------------------------------------------------------
def init_raw_params(key, num_features, hid_dim, sf_dim, hops):
    h2 = hid_dim // 2
    s_in = hops * (hops + 2)

    def linear(k, fan_in, fan_out):
        kw, kb = jax.random.split(k)
        bound = 1.0 / jnp.sqrt(fan_in)
        w = jax.random.uniform(kw, (fan_in, fan_out), jnp.float32, -bound, bound)
        b = jax.random.uniform(kb, (fan_out,), jnp.float32, -bound, bound)
        return w, b

    ks = jax.random.split(key, 12)
    w1, b1 = linear(ks[0], num_features, hid_dim)        # nf_lin1
    w2, b2 = linear(ks[1], 2 * hid_dim, h2)              # nf_lin2
    wsg, bsg = linear(ks[2], s_in, sf_dim)               # sg_lin
    wout, bout = linear(ks[3], sf_dim + h2, 1)           # output

    def bn(kg, kb, km, kv, dim):
        gamma = jax.random.uniform(kg, (dim,), jnp.float32, 0.5, 1.5)
        beta = jax.random.uniform(kb, (dim,), jnp.float32, -0.5, 0.5)
        mean = 0.1 * jax.random.normal(km, (dim,), jnp.float32)
        var = jax.random.uniform(kv, (dim,), jnp.float32, 0.5, 1.5)
        return gamma, beta, mean, var

    g2, be2, m2, v2 = bn(ks[4], ks[5], ks[6], ks[7], h2)        # bn2
    g1, be1, m1, v1 = bn(ks[8], ks[9], ks[10], ks[11], sf_dim)  # bn1
    return dict(
        w1=w1, b1=b1, w2=w2, b2=b2,
        bn2_gamma=g2, bn2_beta=be2, bn2_mean=m2, bn2_var=v2,
        wsg=wsg, bsg=bsg,
        bn1_gamma=g1, bn1_beta=be1, bn1_mean=m1, bn1_var=v1,
        wout=wout, bout=bout,
    )


def fold_params(raw, eps=1e-5):
    """Fold nf_lin1 into nf_lin2, both eval BatchNorms into the linears, and
    stack everything into one (SD+H2, 2F+S) weight matching the per-link
    feature-table column layout [x0(F) | x1(F) | sf(S)]."""
    w1, b1 = raw["w1"], raw["b1"]
    w2, b2 = raw["w2"], raw["b2"]
    F = w1.shape[0]
    hid = w1.shape[1]
    H2 = w2.shape[1]
    S = raw["wsg"].shape[0]
    SD = raw["wsg"].shape[1]

    w2a, w2b = w2[:hid, :], w2[hid:, :]
    bn2_scale = raw["bn2_gamma"] / jnp.sqrt(raw["bn2_var"] + eps)      # (H2,)
    bn2_shift = raw["bn2_beta"] - raw["bn2_mean"] * bn2_scale
    wa = (w1 @ w2a) * bn2_scale[None, :]                               # (F, H2)
    wb = (w1 @ w2b) * bn2_scale[None, :]
    bnf = (b1 @ w2a + b1 @ w2b + b2) * bn2_scale + bn2_shift           # (H2,)

    bn1_scale = raw["bn1_gamma"] / jnp.sqrt(raw["bn1_var"] + eps)      # (SD,)
    bn1_shift = raw["bn1_beta"] - raw["bn1_mean"] * bn1_scale
    wsg_f = raw["wsg"] * bn1_scale[None, :]                            # (S, SD)
    bsg_f = raw["bsg"] * bn1_scale + bn1_shift                         # (SD,)

    HD = SD + H2
    w_all = jnp.zeros((HD, 2 * F + S), jnp.float32)
    w_all = w_all.at[SD:, :F].set(wa.T)          # nf branch, endpoint 0
    w_all = w_all.at[SD:, F:2 * F].set(wb.T)     # nf branch, endpoint 1
    w_all = w_all.at[:SD, 2 * F:].set(wsg_f.T)   # sg branch
    b_all = jnp.concatenate([bsg_f, bnf])[:, None]                     # (HD, 1)

    return dict(
        w_all=w_all, b_all=b_all,
        w_head=raw["wout"],                      # (SD+H2, 1), order [sf; nf]
        b_head=raw["bout"][:, None],             # (1, 1)
    )


def reference_forward(data_x, subgraph_features, links, sample_indices,
                      indices, raw, eps=1e-5):
    """Pure-JAX reference matching the PyTorch module in eval mode."""
    pair = links[indices]
    nf = data_x[pair].astype(jnp.float32)                          # (B, 2, F)
    h = jnp.einsum("bpf,fh->bph", nf, raw["w1"]) + raw["b1"]
    hc = jnp.concatenate([h[:, 0, :], h[:, 1, :]], axis=1)
    h2 = hc @ raw["w2"] + raw["b2"]
    h2 = ((h2 - raw["bn2_mean"]) / jnp.sqrt(raw["bn2_var"] + eps)
          * raw["bn2_gamma"] + raw["bn2_beta"])
    nfh = jnp.maximum(h2, 0.0)
    sf = subgraph_features[sample_indices[indices]].astype(jnp.float32)
    s = sf @ raw["wsg"] + raw["bsg"]
    s = ((s - raw["bn1_mean"]) / jnp.sqrt(raw["bn1_var"] + eps)
         * raw["bn1_gamma"] + raw["bn1_beta"])
    sfh = jnp.maximum(s, 0.0)
    x = jnp.concatenate([sfh, nfh], axis=1)
    z = x @ raw["wout"] + raw["bout"]
    return 1.0 / (1.0 + jnp.exp(-z))


if __name__ == "__main__":
    num_features = 16
    hid_dim = 32          # args.hidden_dim
    sf_dim = 8            # args.s_dim
    hops = 2              # subgraph feature dim = hops*(hops+2) = 8
    num_nodes = 64
    num_links = 40

    key = jax.random.PRNGKey(0)
    kx, ksf, kl, kp, ki1, ki2, ki3 = jax.random.split(key, 7)

    data_x = jax.random.normal(kx, (num_nodes, num_features), jnp.float32)
    subgraph_features = jax.random.normal(
        ksf, (num_links, hops * (hops + 2)), jnp.float32)
    links = jax.random.randint(kl, (num_links, 2), 0, num_nodes)
    sample_indices = jnp.arange(num_links, dtype=jnp.int32)

    raw = init_raw_params(kp, num_features, hid_dim, sf_dim, hops)
    folded = fold_params(raw)

    # batch=8/600 -> 1 tile (padded); batch=20000 -> 5 tiles (exercises the
    # grid and the "parallel" megacore split).
    for kb, batch in ((ki1, 8), (ki2, 600), (ki3, 20000)):
        indices = jax.random.randint(kb, (batch,), 0, num_links)
        out = model_forward(data_x, subgraph_features, links, sample_indices,
                            indices, folded)
        out = jax.block_until_ready(out)
        ref = reference_forward(data_x, subgraph_features, links,
                                sample_indices, indices, raw)
        assert out.shape == (batch, 1)
        max_err = float(jnp.max(jnp.abs(out - ref)))
        assert jnp.allclose(out, ref, atol=1e-4, rtol=1e-4), max_err

    print("KERNEL_OK")
</pallas_src>

<mosaic_0001>
module attributes {stable_mosaic.version = 11 : i64} {
  func.func @fused_link_mlp_kernel(%arg0: i32, %arg1: memref<1x4096xi32, #tpu.memory_space<vmem>>, %arg2: memref<40x40xf32, #tpu.memory_space<vmem>>, %arg3: memref<24x40xf32, #tpu.memory_space<vmem>>, %arg4: memref<24x1xf32, #tpu.memory_space<vmem>>, %arg5: memref<24x1xf32, #tpu.memory_space<vmem>>, %arg6: memref<1x1xf32, #tpu.memory_space<vmem>>, %arg7: memref<1x4096xf32, #tpu.memory_space<vmem>>) attributes {dimension_semantics = [#tpu.dimension_semantics<parallel>], iteration_bounds = array<i64: 1>, scalar_prefetch = 0 : i64, scratch_operands = 0 : i64, tpu.core_type = #tpu.core_type<tc>, window_params = [{transform_indices = @transform_0, window_bounds = array<i64: 1, 4096>}, {pipeline_mode = #tpu.pipeline_mode<synchronous>, transform_indices = @transform_1, window_bounds = array<i64: 40, 40>}, {pipeline_mode = #tpu.pipeline_mode<synchronous>, transform_indices = @transform_2, window_bounds = array<i64: 24, 40>}, {pipeline_mode = #tpu.pipeline_mode<synchronous>, transform_indices = @transform_3, window_bounds = array<i64: 24, 1>}, {pipeline_mode = #tpu.pipeline_mode<synchronous>, transform_indices = @transform_4, window_bounds = array<i64: 24, 1>}, {pipeline_mode = #tpu.pipeline_mode<synchronous>, transform_indices = @transform_5, window_bounds = array<i64: 1, 1>}, {transform_indices = @transform_6, window_bounds = array<i64: 1, 4096>}]} {
    %0 = tpu.iota {dimensions = array<i32: 0>} : vector<40x4096xi32>
    %c0 = arith.constant 0 : index
    %c0_0 = arith.constant 0 : index
    %1 = vector.load %arg1[%c0, %c0_0] : memref<1x4096xi32, #tpu.memory_space<vmem>>, vector<1x4096xi32>
    %2 = vector.broadcast %1 : vector<1x4096xi32> to vector<40x4096xi32>
    %3 = arith.cmpi eq, %0, %2 : vector<40x4096xi32>
    %4 = arith.extui %3 : vector<40x4096xi1> to vector<40x4096xi32>
    %5 = arith.sitofp %4 : vector<40x4096xi32> to vector<40x4096xf32>
    %c0_1 = arith.constant 0 : index
    %c0_2 = arith.constant 0 : index
    %6 = vector.load %arg2[%c0_1, %c0_2] : memref<40x40xf32, #tpu.memory_space<vmem>>, vector<40x40xf32>
    %cst = arith.constant dense<0.000000e+00> : vector<40x4096xf32>
    %7 = tpu.matmul %6, %5, %cst {dimension_numbers = #tpu.dot_dimension_numbers<[1], [0], [0], [1], [0, 0, 1, 1], [], []>} : vector<40x40xf32>, vector<40x4096xf32>, vector<40x4096xf32> -> vector<40x4096xf32>
    %c0_3 = arith.constant 0 : index
    %c0_4 = arith.constant 0 : index
    %8 = vector.load %arg3[%c0_3, %c0_4] : memref<24x40xf32, #tpu.memory_space<vmem>>, vector<24x40xf32>
    %cst_5 = arith.constant dense<0.000000e+00> : vector<24x4096xf32>
    %9 = tpu.matmul %8, %7, %cst_5 {dimension_numbers = #tpu.dot_dimension_numbers<[1], [0], [0], [1], [0, 0, 1, 1], [], []>} : vector<24x40xf32>, vector<40x4096xf32>, vector<24x4096xf32> -> vector<24x4096xf32>
    %c0_6 = arith.constant 0 : index
    %c0_7 = arith.constant 0 : index
    %10 = vector.load %arg4[%c0_6, %c0_7] : memref<24x1xf32, #tpu.memory_space<vmem>>, vector<24x1xf32>
    %11 = vector.broadcast %10 : vector<24x1xf32> to vector<24x4096xf32>
    %12 = arith.addf %9, %11 : vector<24x4096xf32>
    %cst_8 = arith.constant 0.000000e+00 : f32
    %13 = vector.broadcast %cst_8 : f32 to vector<24x4096xf32>
    %14 = arith.maximumf %12, %13 : vector<24x4096xf32>
    %c0_9 = arith.constant 0 : index
    %c0_10 = arith.constant 0 : index
    %15 = vector.load %arg5[%c0_9, %c0_10] : memref<24x1xf32, #tpu.memory_space<vmem>>, vector<24x1xf32>
    %16 = vector.broadcast %15 : vector<24x1xf32> to vector<24x4096xf32>
    %17 = arith.mulf %14, %16 : vector<24x4096xf32>
    %cst_11 = arith.constant dense<0.000000e+00> : vector<4096xf32>
    %18 = vector.multi_reduction <add>, %17, %cst_11 [0] : vector<24x4096xf32> to vector<4096xf32>
    %19 = vector.shape_cast %18 : vector<4096xf32> to vector<1x4096xf32>
    %c0_12 = arith.constant 0 : index
    %c0_13 = arith.constant 0 : index
    %20 = vector.load %arg6[%c0_12, %c0_13] : memref<1x1xf32, #tpu.memory_space<vmem>>, vector<1x1xf32>
    %21 = vector.broadcast %20 : vector<1x1xf32> to vector<1x4096xf32>
    %22 = arith.addf %19, %21 : vector<1x4096xf32>
    %cst_14 = arith.constant 0.000000e+00 : f32
    %23 = vector.broadcast %cst_14 : f32 to vector<1x4096xf32>
    %24 = arith.subf %23, %22 : vector<1x4096xf32>
    %25 = math.exp %24 : vector<1x4096xf32>
    %cst_15 = arith.constant 1.000000e+00 : f32
    %26 = vector.broadcast %cst_15 : f32 to vector<1x4096xf32>
    %27 = arith.addf %26, %25 : vector<1x4096xf32>
    %28 = tpu.reciprocal %27 : vector<1x4096xf32> -> vector<1x4096xf32>
    %c0_16 = arith.constant 0 : index
    %c0_17 = arith.constant 0 : index
    %29 = vector.load %arg7[%c0_16, %c0_17] : memref<1x4096xf32, #tpu.memory_space<vmem>>, vector<1x4096xf32>
    tpu.vector_store %arg7[%c0_16, %c0_17], %28 {strides = array<i32>} : memref<1x4096xf32, #tpu.memory_space<vmem>>, vector<1x4096xf32>,
    return
  }
  func.func @transform_0(%arg0: i32) -> (i32, i32) {
    %c0_i32 = arith.constant 0 : i32
    %c0_i32_0 = arith.constant 0 : i32
    return %c0_i32, %arg0 : i32, i32
  }
  func.func @transform_1(%arg0: i32) -> (i32, i32) {
    %c0_i32 = arith.constant 0 : i32
    %c0_i32_0 = arith.constant 0 : i32
    %c0_i32_1 = arith.constant 0 : i32
    return %c0_i32, %c0_i32_0 : i32, i32
  }
  func.func @transform_2(%arg0: i32) -> (i32, i32) {
    %c0_i32 = arith.constant 0 : i32
    %c0_i32_0 = arith.constant 0 : i32
    %c0_i32_1 = arith.constant 0 : i32
    return %c0_i32, %c0_i32_0 : i32, i32
  }
  func.func @transform_3(%arg0: i32) -> (i32, i32) {
    %c0_i32 = arith.constant 0 : i32
    %c0_i32_0 = arith.constant 0 : i32
    %c0_i32_1 = arith.constant 0 : i32
    return %c0_i32, %c0_i32_0 : i32, i32
  }
  func.func @transform_4(%arg0: i32) -> (i32, i32) {
    %c0_i32 = arith.constant 0 : i32
    %c0_i32_0 = arith.constant 0 : i32
    %c0_i32_1 = arith.constant 0 : i32
    return %c0_i32, %c0_i32_0 : i32, i32
  }
  func.func @transform_5(%arg0: i32) -> (i32, i32) {
    %c0_i32 = arith.constant 0 : i32
    %c0_i32_0 = arith.constant 0 : i32
    %c0_i32_1 = arith.constant 0 : i32
    return %c0_i32, %c0_i32_0 : i32, i32
  }
  func.func @transform_6(%arg0: i32) -> (i32, i32) {
    %c0_i32 = arith.constant 0 : i32
    %c0_i32_0 = arith.constant 0 : i32
    return %c0_i32, %arg0 : i32, i32
  }
}

</mosaic_0001>

<bundles_post_ra>
// kernel: model_forward.1
= control target key start
LH: loop header
LB: loop body
LE: loop exit
PB: predicated region body
PF: predicated region fallthrough
CT: control target
= control target key end

     0   :  { %v25_v0 = vlaneseq  ;;  %v5032_v1 = vmov 0.0   ;;  %v5033_v16 = vmov 1.0   ;;  %s6872_s0 = inlined_call_operand.vmem [shape: s32[1,4096], index: 0, kind: input, shape index: {}]   ;;  %s6873_s1 = inlined_call_operand.vmem [shape: f32[40,40], index: 1, kind: input, shape index: {}]   ;;  %s6874_s3 = inlined_call_operand.vmem [shape: f32[24,1], index: 3, kind: input, shape index: {}]   ;;  %s6875_s2 = inlined_call_operand.vmem [shape: f32[24,40], index: 2, kind: input, shape index: {}]   ;;  %s6876_s4 = inlined_call_operand.vmem [shape: f32[24,1], index: 4, kind: input, shape index: {}]   ;;  %s6877_s5 = inlined_call_operand.<no memory space> [shape: f32[1,1], index: 5, kind: input, shape index: {}]   ;;  %s6878_s6 = inlined_call_operand.vmem [shape: f32[1,4096], index: 6, kind: output, shape index: {}]  }
   0x1   :  { %728 = vmatprep.mubr.f32.mxu0 %v5032_v1  ;;  %823 = vmatprep.mubr.f32.mxu1 %v5032_v1  ;;  %v31_v3 = vld [vmem:[%s6872_s0] sm:$0xff]  ;;  %v5200_v26 = vld [vmem:[%s6873_s1 + $0x8] sm:$0xff]  ;;  %v5223_v27 = vld [vmem:[%s6873_s1 + $0x10] sm:$0xff] }
   0x2   :  { %v5073_v2 = vshrl.u32 %v25_v0, 7  ;;  %v5171_v25 = vld [vmem:[%s6873_s1] sm:$0xff]  ;;  %v5244_v28 = vld [vmem:[%s6872_s0 + $0x8] sm:$0xff]  ;;  %v5251_v29 = vld [vmem:[%s6873_s1 + $0x18] sm:$0xff] }
   0x3   :  { %v5256_v30 = vld [vmem:[%s6872_s0 + $0x10] sm:$0xff]  ;;  %v5287_v33 = vld [vmem:[%s6873_s1 + $0x20] sm:$0xff]  ;;  %v5436_v40 = vld [vmem:[%s6872_s0 + $0x18] sm:$0xff] }
   0x4   :  { %v5079_v4 = vadd.s32 32, %v5073_v2  ;;  %v5082_v5 = vsub.s32 1, %v5073_v2  ;;  %v5085_v6 = vsub.s32 3, %v5073_v2  ;;  %v5088_v7 = vsub.s32 0, %v5073_v2 }
   0x5   :  { %v5091_v8 = vsub.s32 2, %v5073_v2  ;;  %v5094_v9 = vadd.s32 24, %v5073_v2  ;;  %v5100_v13 = vadd.s32 16, %v5073_v2  ;;  %v5104_v15 = vadd.s32 8, %v5073_v2 }
   0x6   :  { %v42_v10 = vrot.slane %v31_v3, %v5082_v5  ;;  %v50_v11 = vrot.slane %v31_v3, %v5085_v6  ;;  %v38_v12 = vrot.slane %v31_v3, %v5088_v7  ;;  %v5116_v17 = vsub.s32 5, %v5073_v2 }
   0x7   :  { %v46_v14 = vrot.slane %v31_v3, %v5091_v8  ;;  %v5124_v18 = vsub.s32 7, %v5073_v2  ;;  %v5131_v19 = vsub.s32 4, %v5073_v2  ;;  %v5134_v20 = vsub.s32 6, %v5073_v2 }
   0x8   :  { %vm292_vm0 = vcmp.eq.s32.totalorder %v5079_v4, %v42_v10  ;;  %vm294_vm1 = vcmp.eq.s32.totalorder %v5079_v4, %v50_v11  ;;  %vm291_vm2 = vcmp.eq.s32.totalorder %v5079_v4, %v38_v12  ;;  %vm260_vm3 = vcmp.eq.s32.totalorder %v5094_v9, %v42_v10 }
   0x9   :  { %4610 = vmatprep.subr.msk.mxu0 %vm292_vm0, %v5033_v16  ;;  %4625 = vmatprep.subr.msk.mxu1 %vm294_vm1, %v5033_v16  ;;  %vm293_vm4 = vcmp.eq.s32.totalorder %v5079_v4, %v46_v14  ;;  %vm262_vm5 = vcmp.eq.s32.totalorder %v5094_v9, %v50_v11  ;;  %vm259_vm6 = vcmp.eq.s32.totalorder %v5094_v9, %v38_v12 }
   0xa   :  { %4611 = vmatpush1.msk.msra.mxu0 %vm291_vm2, %v5033_v16  ;;  %4626 = vmatpush1.msk.msra.mxu1 %vm293_vm4, %v5033_v16  ;;  %vm261_vm7 = vcmp.eq.s32.totalorder %v5094_v9, %v46_v14  ;;  %vm228_vm8 = vcmp.eq.s32.totalorder %v5100_v13, %v42_v10  ;;  %vm230_vm9 = vcmp.eq.s32.totalorder %v5100_v13, %v50_v11  ;;  %vm648_vm4 = vcmask 326656  }
   0xb   :  { %4612 = vmatprep.subr.msk.mxu0 %vm260_vm3, %v5033_v16  ;;  %4627 = vmatprep.subr.msk.mxu1 %vm262_vm5, %v5033_v16  ;;  %vm227_vm10 = vcmp.eq.s32.totalorder %v5100_v13, %v38_v12  ;;  %vm229_vm11 = vcmp.eq.s32.totalorder %v5100_v13, %v46_v14  ;;  %vm196_vm12 = vcmp.eq.s32.totalorder %v5104_v15, %v42_v10 }
   0xc   :  { %4613 = vmatpush1.msk.msra.mxu0 %vm259_vm6, %v5033_v16  ;;  %4628 = vmatpush1.msk.msra.mxu1 %vm261_vm7, %v5033_v16  ;;  %vm198_vm13 = vcmp.eq.s32.totalorder %v5104_v15, %v50_v11  ;;  %vm195_vm14 = vcmp.eq.s32.totalorder %v5104_v15, %v38_v12  ;;  %vm197_vm15 = vcmp.eq.s32.totalorder %v5104_v15, %v46_v14 }
   0xd   :  { %4614 = vmatprep.subr.msk.mxu0 %vm228_vm8, %v5033_v16  ;;  %4629 = vmatprep.subr.msk.mxu1 %vm230_vm9, %v5033_v16  ;;  %vm164_vm0 = vcmp.eq.s32.totalorder %v5073_v2, %v42_v10  ;;  %vm166_vm1 = vcmp.eq.s32.totalorder %v5073_v2, %v50_v11  ;;  %vm163_vm2 = vcmp.eq.s32.totalorder %v5073_v2, %v38_v12  ;;  %v5034_v12 = vmov 0  }
   0xe   :  { %4615 = vmatpush1.msk.msra.mxu0 %vm227_vm10, %v5033_v16  ;;  %4630 = vmatpush1.msk.msra.mxu1 %vm229_vm11, %v5033_v16  ;;  %v5150_v21 = vrot.slane %v31_v3, %v5116_v17  ;;  %v5153_v22 = vrot.slane %v31_v3, %v5124_v18  ;;  %vm165_vm3 = vcmp.eq.s32.totalorder %v5073_v2, %v46_v14 }
   0xf   :  { %4616 = vmatprep.subr.msk.mxu0 %vm196_vm12, %v5033_v16  ;;  %4631 = vmatprep.subr.msk.mxu1 %vm198_vm13, %v5033_v16  ;;  %v5159_v23 = vrot.slane %v31_v3, %v5131_v19  ;;  %v5162_v24 = vrot.slane %v31_v3, %v5134_v20  ;;  %v5268_v31 = vrot.slane %v5244_v28, %v5082_v5 }
  0x10   :  { %4617 = vmatpush1.msk.msra.mxu0 %vm195_vm14, %v5033_v16  ;;  %4632 = vmatpush1.msk.msra.mxu1 %vm197_vm15, %v5033_v16  ;;  %vm296_vm5 = vcmp.eq.s32.totalorder %v5079_v4, %v5150_v21  ;;  %vm298_vm6 = vcmp.eq.s32.totalorder %v5079_v4, %v5153_v22  ;;  %vm264_vm9 = vcmp.eq.s32.totalorder %v5094_v9, %v5150_v21 }
  0x11   :  { %4618 = vmatprep.subr.msk.mxu0 %vm164_vm0, %v5033_v16  ;;  %4633 = vmatprep.subr.msk.mxu1 %vm166_vm1, %v5033_v16  ;;  %vm295_vm7 = vcmp.eq.s32.totalorder %v5079_v4, %v5159_v23  ;;  %vm297_vm8 = vcmp.eq.s32.totalorder %v5079_v4, %v5162_v24  ;;  %vm266_vm10 = vcmp.eq.s32.totalorder %v5094_v9, %v5153_v22 }
  0x12   :  { %4619 = vmatpush1.msk.msra.mxu0 %vm163_vm2, %v5033_v16  ;;  %4634 = vmatpush1.msk.msra.mxu1 %vm165_vm3, %v5033_v16  ;;  %vm263_vm11 = vcmp.eq.s32.totalorder %v5094_v9, %v5159_v23  ;;  %vm265_vm12 = vcmp.eq.s32.totalorder %v5094_v9, %v5162_v24  ;;  %vm232_vm13 = vcmp.eq.s32.totalorder %v5100_v13, %v5150_v21 }
  0x13   :  { %4620 = vmatmul.mubr.msk.f32.vlgmr.msra.gmra.mxu0 %vm648_vm4, %v5171_v25  ;;  %4635 = vmatmul.mubr.msk.f32.vlgmr.msra.gmra.mxu1 %vm648_vm4, %v5171_v25  ;;  %vm234_vm14 = vcmp.eq.s32.totalorder %v5100_v13, %v5153_v22  ;;  %vm231_vm15 = vcmp.eq.s32.totalorder %v5100_v13, %v5159_v23  ;;  %vm233_vm0 = vcmp.eq.s32.totalorder %v5100_v13, %v5162_v24 }
  0x14   :  { %4640 = vmatprep.subr.msk.mxu0 %vm296_vm5, %v5033_v16  ;;  %4655 = vmatprep.subr.msk.mxu1 %vm298_vm6, %v5033_v16  ;;  %vm200_vm1 = vcmp.eq.s32.totalorder %v5104_v15, %v5150_v21  ;;  %vm202_vm2 = vcmp.eq.s32.totalorder %v5104_v15, %v5153_v22  ;;  %vm199_vm3 = vcmp.eq.s32.totalorder %v5104_v15, %v5159_v23 }
  0x15   :  { %734 = vmatprep.mubr.f32.mxu0 %v5032_v1  ;;  %829 = vmatprep.mubr.f32.mxu1 %v5032_v1  ;;  %vm201_vm5 = vcmp.eq.s32.totalorder %v5104_v15, %v5162_v24  ;;  %v5280_v32 = vrot.slane %v5256_v30, %v5082_v5  ;;  %v5291_v34 = vrot.slane %v5244_v28, %v5085_v6 }
  0x16   :  { %4641 = vmatpush1.msk.msra.mxu0 %vm295_vm7, %v5033_v16  ;;  %4656 = vmatpush1.msk.msra.mxu1 %vm297_vm8, %v5033_v16  ;;  %v5295_v35 = vrot.slane %v5244_v28, %v5088_v7  ;;  %vm168_vm6 = vcmp.eq.s32.totalorder %v5073_v2, %v5150_v21  ;;  %vm170_vm7 = vcmp.eq.s32.totalorder %v5073_v2, %v5153_v22 }
  0x17   :  { %4621 = vmatmul.mubr.msk.f32.gmra.mxu0 %vm648_vm4, %v5200_v26  ;;  %4636 = vmatmul.mubr.msk.f32.gmra.mxu1 %vm648_vm4, %v5200_v26  ;;  %v5305_v36 = vrot.slane %v5244_v28, %v5091_v8  ;;  %vm167_vm8 = vcmp.eq.s32.totalorder %v5073_v2, %v5159_v23  ;;  %v5355_v37 = vrot.slane %v5256_v30, %v5085_v6 }
  0x18   :  { %4642 = vmatprep.subr.msk.mxu0 %vm264_vm9, %v5033_v16  ;;  %4657 = vmatprep.subr.msk.mxu1 %vm266_vm10, %v5033_v16  ;;  %vm169_vm9 = vcmp.eq.s32.totalorder %v5073_v2, %v5162_v24  ;;  %vm300_vm10 = vcmp.eq.s32.totalorder %v5079_v4, %v5268_v31  ;;  %v5359_v38 = vrot.slane %v5256_v30, %v5088_v7 }
  0x19   :  { %740 = vmatprep.mubr.f32.mxu0 %v5032_v1  ;;  %835 = vmatprep.mubr.f32.mxu1 %v5032_v1  ;;  %v5363_v39 = vrot.slane %v5256_v30, %v5091_v8  ;;  %v5446_v41 = vrot.slane %v5244_v28, %v5116_v17  ;;  %v5450_v42 = vrot.slane %v5244_v28, %v5124_v18 }
  0x1a   :  { %4643 = vmatpush1.msk.msra.mxu0 %vm263_vm11, %v5033_v16  ;;  %4658 = vmatpush1.msk.msra.mxu1 %vm265_vm12, %v5033_v16  ;;  %vm302_vm11 = vcmp.eq.s32.totalorder %v5079_v4, %v5291_v34  ;;  %vm299_vm12 = vcmp.eq.s32.totalorder %v5079_v4, %v5295_v35  ;;  %v5454_v43 = vrot.slane %v5244_v28, %v5131_v19 }
  0x1b   :  { %4622 = vmatmul.mubr.msk.f32.gmra.mxu0 %vm648_vm4, %v5223_v27  ;;  %4637 = vmatmul.mubr.msk.f32.gmra.mxu1 %vm648_vm4, %v5223_v27  ;;  %v5468_v44 = vrot.slane %v5244_v28, %v5134_v20  ;;  %v5472_v45 = vrot.slane %v5256_v30, %v5116_v17  ;;  %v5476_v46 = vrot.slane %v5256_v30, %v5124_v18 }
  0x1c   :  { %4644 = vmatprep.subr.msk.mxu0 %vm232_vm13, %v5033_v16  ;;  %4659 = vmatprep.subr.msk.mxu1 %vm234_vm14, %v5033_v16  ;;  %vm268_vm13 = vcmp.eq.s32.totalorder %v5094_v9, %v5268_v31  ;;  %vm301_vm14 = vcmp.eq.s32.totalorder %v5079_v4, %v5305_v36  ;;  %v5486_v47 = vrot.slane %v5256_v30, %v5131_v19 }
  0x1d   :  { %746 = vmatprep.mubr.f32.mxu0 %v5032_v1  ;;  %841 = vmatprep.mubr.f32.mxu1 %v5032_v1  ;;  %v5490_v48 = vrot.slane %v5256_v30, %v5134_v20  ;;  %v5494_v49 = vrot.slane %v5436_v40, %v5082_v5  ;;  %v5590_v50 = vrot.slane %v5436_v40, %v5085_v6  ;;  %v2188_v30 = vld [vmem:[%s6874_s3 + $0x8] sm:$0xff] }
  0x1e   :  { %4645 = vmatpush1.msk.msra.mxu0 %vm231_vm15, %v5033_v16  ;;  %4660 = vmatpush1.msk.msra.mxu1 %vm233_vm0, %v5033_v16  ;;  %vm270_vm15 = vcmp.eq.s32.totalorder %v5094_v9, %v5291_v34  ;;  %vm267_vm0 = vcmp.eq.s32.totalorder %v5094_v9, %v5295_v35  ;;  %v5594_v51 = vrot.slane %v5436_v40, %v5088_v7 }
  0x1f   :  { %4623 = vmatmul.mubr.msk.f32.gmra.mxu0 %vm648_vm4, %v5251_v29  ;;  %4638 = vmatmul.mubr.msk.f32.gmra.mxu1 %vm648_vm4, %v5251_v29  ;;  %v5598_v52 = vrot.slane %v5436_v40, %v5091_v8  ;;  %v5680_v53 = vrot.slane %v5436_v40, %v5116_v17  ;;  %v5684_v54 = vrot.slane %v5436_v40, %v5124_v18 }
  0x20   :  { %4646 = vmatprep.subr.msk.mxu0 %vm200_vm1, %v5033_v16  ;;  %4661 = vmatprep.subr.msk.mxu1 %vm202_vm2, %v5033_v16  ;;  %vm236_vm1 = vcmp.eq.s32.totalorder %v5100_v13, %v5268_v31  ;;  %vm269_vm2 = vcmp.eq.s32.totalorder %v5094_v9, %v5305_v36  ;;  %v5694_v55 = vrot.slane %v5436_v40, %v5131_v19 }
  0x21   :  { %752 = vmatprep.mubr.f32.mxu0 %v5032_v1  ;;  %847 = vmatprep.mubr.f32.mxu1 %v5032_v1  ;;  %v5698_v56 = vrot.slane %v5436_v40, %v5134_v20 }
  0x22   :  { %4647 = vmatpush1.msk.msra.mxu0 %vm199_vm3, %v5033_v16  ;;  %4662 = vmatpush1.msk.msra.mxu1 %vm201_vm5, %v5033_v16  ;;  %vm238_vm3 = vcmp.eq.s32.totalorder %v5100_v13, %v5291_v34  ;;  %vm282_vm5 = vcmp.eq.s32.totalorder %v5094_v9, %v5476_v46 }
  0x23   :  { %4624 = vmatmul.mubr.msk.f32.gmra.mxu0 %vm648_vm4, %v5287_v33  ;;  %4639 = vmatmul.mubr.msk.f32.gmra.mxu1 %vm648_vm4, %v5287_v33 }
  0x24   :  { %4648 = vmatprep.subr.msk.mxu0 %vm168_vm6, %v5033_v16  ;;  %4663 = vmatprep.subr.msk.mxu1 %vm170_vm7, %v5033_v16  ;;  %vm235_vm6 = vcmp.eq.s32.totalorder %v5100_v13, %v5295_v35  ;;  %vm206_vm7 = vcmp.eq.s32.totalorder %v5104_v15, %v5291_v34 }
  0x25   :  { %4649 = vmatpush1.msk.msra.mxu0 %vm167_vm8, %v5033_v16  ;;  %918 = vmatprep.mubr.f32.mxu0 %v5032_v1  ;;  %vm272_vm8 = vcmp.eq.s32.totalorder %v5094_v9, %v5446_v41 }
  0x26   :  { %4664 = vmatpush1.msk.msra.mxu1 %vm169_vm9, %v5033_v16  ;;  %1013 = vmatprep.mubr.f32.mxu1 %v5032_v1  ;;  %vm6879_vm9 = vcmp.eq.s32.totalorder %v5100_v13, %v5305_v36 }
  0x27   :  { %4650 = vmatmul.mubr.msk.f32.vlgmr.msra.gmra.mxu0 %vm648_vm4, %v5171_v25  ;;  %4665 = vmatmul.mubr.msk.f32.vlgmr.msra.gmra.mxu1 %vm648_vm4, %v5171_v25 }
  0x28   :  { %4670 = vmatprep.subr.msk.mxu0 %vm300_vm10, %v5033_v16  ;;  %4685 = vmatprep.subr.msk.mxu1 %vm302_vm11, %v5033_v16  ;;  %vm204_vm10 = vcmp.eq.s32.totalorder %v5104_v15, %v5268_v31  ;;  %vm171_vm11 = vcmp.eq.s32.totalorder %v5073_v2, %v5295_v35 }
  0x29   :  { %924 = vmatprep.mubr.f32.mxu0 %v5032_v1  ;;  %1019 = vmatprep.mubr.f32.mxu1 %v5032_v1 }
  0x2a   :  { %4671 = vmatpush1.msk.msra.mxu0 %vm299_vm12, %v5033_v16  ;;  %4686 = vmatpush1.msk.msra.mxu1 %vm301_vm14, %v5033_v16  ;;  %vm203_vm12 = vcmp.eq.s32.totalorder %v5104_v15, %v5295_v35  ;;  %vm205_vm14 = vcmp.eq.s32.totalorder %v5104_v15, %v5305_v36  ;;  %v11_v35 = vstv %s6877_s5 }
  0x2b   :  { %4651 = vmatmul.mubr.msk.f32.gmra.mxu0 %vm648_vm4, %v5200_v26  ;;  %4666 = vmatmul.mubr.msk.f32.gmra.mxu1 %vm648_vm4, %v5200_v26  ;;  %12 = vst [vmem:[#allocation2] sm:$0x1] %v11_v35 }
  0x2c   :  { %4672 = vmatprep.subr.msk.mxu0 %vm268_vm13, %v5033_v16  ;;  %4687 = vmatprep.subr.msk.mxu1 %vm270_vm15, %v5033_v16  ;;  %vm172_vm13 = vcmp.eq.s32.totalorder %v5073_v2, %v5268_v31  ;;  %vm174_vm15 = vcmp.eq.s32.totalorder %v5073_v2, %v5291_v34  ;;  %v3638_v31 = vld [vmem:[%s6876_s4] sm:$0xff]  ;;  %v6304_v34 = vld [vmem:[%s6875_s2 + $0x8] sm:$0xff] }
  0x2d   :  { %930 = vmatprep.mubr.f32.mxu0 %v5032_v1  ;;  %1025 = vmatprep.mubr.f32.mxu1 %v5032_v1 }
  0x2e   :  { %4673 = vmatpush1.msk.msra.mxu0 %vm267_vm0, %v5033_v16  ;;  %4688 = vmatpush1.msk.msra.mxu1 %vm269_vm2, %v5033_v16  ;;  %vm173_vm0 = vcmp.eq.s32.totalorder %v5073_v2, %v5305_v36  ;;  %vm6880_vm2 = vcmp.eq.s32.totalorder %v5079_v4, %v5450_v42 }
  0x2f   :  { %4652 = vmatmul.mubr.msk.f32.gmra.mxu0 %vm648_vm4, %v5223_v27  ;;  %4667 = vmatmul.mubr.msk.f32.gmra.mxu1 %vm648_vm4, %v5223_v27 }
  0x30   :  { %4674 = vmatprep.subr.msk.mxu0 %vm236_vm1, %v5033_v16  ;;  %4689 = vmatprep.subr.msk.mxu1 %vm238_vm3, %v5033_v16  ;;  %vm304_vm1 = vcmp.eq.s32.totalorder %v5079_v4, %v5446_v41  ;;  %vm281_vm3 = vcmp.eq.s32.totalorder %v5094_v9, %v5490_v48 }
  0x31   :  { %936 = vmatprep.mubr.f32.mxu0 %v5032_v1  ;;  %1031 = vmatprep.mubr.f32.mxu1 %v5032_v1 }
  0x32   :  { %4675 = vmatpush1.msk.msra.mxu0 %vm235_vm6, %v5033_v16  ;;  %4690 = vmatpush1.msk.msra.mxu1 %vm6879_vm9, %v5033_v16  ;;  %vm305_vm9 = vcmp.eq.s32.totalorder %v5079_v4, %v5468_v44  ;;  %vm274_vm6 = vcmp.eq.s32.totalorder %v5094_v9, %v5450_v42 }
  0x33   :  { %4653 = vmatmul.mubr.msk.f32.gmra.mxu0 %vm648_vm4, %v5251_v29  ;;  %4668 = vmatmul.mubr.msk.f32.gmra.mxu1 %vm648_vm4, %v5251_v29 }
  0x34   :  { %4676 = vmatprep.subr.msk.mxu0 %vm204_vm10, %v5033_v16  ;;  %4691 = vmatprep.subr.msk.mxu1 %vm206_vm7, %v5033_v16  ;;  %vm303_vm10 = vcmp.eq.s32.totalorder %v5079_v4, %v5454_v43  ;;  %vm210_vm7 = vcmp.eq.s32.totalorder %v5104_v15, %v5450_v42 }
  0x35   :  { %942 = vmatprep.mubr.f32.mxu0 %v5032_v1  ;;  %1037 = vmatprep.mubr.f32.mxu1 %v5032_v1 }
  0x36   :  { %4677 = vmatpush1.msk.msra.mxu0 %vm203_vm12, %v5033_v16  ;;  %4692 = vmatpush1.msk.msra.mxu1 %vm205_vm14, %v5033_v16  ;;  %vm271_vm12 = vcmp.eq.s32.totalorder %v5094_v9, %v5454_v43  ;;  %vm239_vm14 = vcmp.eq.s32.totalorder %v5100_v13, %v5454_v43 }
  0x37   :  { %4654 = vmatmul.mubr.msk.f32.gmra.mxu0 %vm648_vm4, %v5287_v33  ;;  %4669 = vmatmul.mubr.msk.f32.gmra.mxu1 %vm648_vm4, %v5287_v33 }
  0x38   :  { %4678 = vmatprep.subr.msk.mxu0 %vm172_vm13, %v5033_v16  ;;  %4693 = vmatprep.subr.msk.mxu1 %vm174_vm15, %v5033_v16  ;;  %vm318_vm13 = vcmp.eq.s32.totalorder %v5079_v4, %v5590_v50  ;;  %vm224_vm15 = vcmp.eq.s32.totalorder %v5104_v15, %v5680_v53 }
  0x39   :  { %4679 = vmatpush1.msk.msra.mxu0 %vm171_vm11, %v5033_v16  ;;  %1108 = vmatprep.mubr.f32.mxu0 %v5032_v1  ;;  %vm240_vm11 = vcmp.eq.s32.totalorder %v5100_v13, %v5446_v41 }
  0x3a   :  { %4694 = vmatpush1.msk.msra.mxu1 %vm173_vm0, %v5033_v16  ;;  %1203 = vmatprep.mubr.f32.mxu1 %v5032_v1  ;;  %vm322_vm0 = vcmp.eq.s32.totalorder %v5079_v4, %v5684_v54 }
  0x3b   :  { %4680 = vmatmul.mubr.msk.f32.vlgmr.msra.gmra.mxu0 %vm648_vm4, %v5171_v25  ;;  %4695 = vmatmul.mubr.msk.f32.vlgmr.msra.gmra.mxu1 %vm648_vm4, %v5171_v25 }
  0x3c   :  { %4700 = vmatprep.subr.msk.mxu0 %vm304_vm1, %v5033_v16  ;;  %4715 = vmatprep.subr.msk.mxu1 %vm6880_vm2, %v5033_v16  ;;  %vm273_vm1 = vcmp.eq.s32.totalorder %v5094_v9, %v5468_v44  ;;  %vm242_vm2 = vcmp.eq.s32.totalorder %v5100_v13, %v5450_v42 }
  0x3d   :  { %1114 = vmatprep.mubr.f32.mxu0 %v5032_v1  ;;  %1209 = vmatprep.mubr.f32.mxu1 %v5032_v1 }
  0x3e   :  { %4701 = vmatpush1.msk.msra.mxu0 %vm303_vm10, %v5033_v16  ;;  %4716 = vmatpush1.msk.msra.mxu1 %vm305_vm9, %v5033_v16  ;;  %vm241_vm9 = vcmp.eq.s32.totalorder %v5100_v13, %v5468_v44  ;;  %vm320_vm10 = vcmp.eq.s32.totalorder %v5079_v4, %v5680_v53 }
  0x3f   :  { %4681 = vmatmul.mubr.msk.f32.gmra.mxu0 %vm648_vm4, %v5200_v26  ;;  %4696 = vmatmul.mubr.msk.f32.gmra.mxu1 %vm648_vm4, %v5200_v26 }
  0x40   :  { %4702 = vmatprep.subr.msk.mxu0 %vm272_vm8, %v5033_v16  ;;  %4717 = vmatprep.subr.msk.mxu1 %vm274_vm6, %v5033_v16  ;;  %vm290_vm6 = vcmp.eq.s32.totalorder %v5094_v9, %v5684_v54  ;;  %vm289_vm8 = vcmp.eq.s32.totalorder %v5094_v9, %v5698_v56 }
  0x41   :  { %1120 = vmatprep.mubr.f32.mxu0 %v5032_v1  ;;  %1215 = vmatprep.mubr.f32.mxu1 %v5032_v1 }
  0x42   :  { %4703 = vmatpush1.msk.msra.mxu0 %vm271_vm12, %v5033_v16  ;;  %4718 = vmatpush1.msk.msra.mxu1 %vm273_vm1, %v5033_v16  ;;  %vm207_vm1 = vcmp.eq.s32.totalorder %v5104_v15, %v5454_v43  ;;  %vm175_vm12 = vcmp.eq.s32.totalorder %v5073_v2, %v5454_v43 }
  0x43   :  { %4682 = vmatmul.mubr.msk.f32.gmra.mxu0 %vm648_vm4, %v5223_v27  ;;  %4697 = vmatmul.mubr.msk.f32.gmra.mxu1 %vm648_vm4, %v5223_v27 }
  0x44   :  { %4704 = vmatprep.subr.msk.mxu0 %vm240_vm11, %v5033_v16  ;;  %4719 = vmatprep.subr.msk.mxu1 %vm242_vm2, %v5033_v16  ;;  %vm208_vm11 = vcmp.eq.s32.totalorder %v5104_v15, %v5446_v41  ;;  %vm209_vm2 = vcmp.eq.s32.totalorder %v5104_v15, %v5468_v44 }
  0x45   :  { %1126 = vmatprep.mubr.f32.mxu0 %v5032_v1  ;;  %1221 = vmatprep.mubr.f32.mxu1 %v5032_v1 }
  0x46   :  { %4705 = vmatpush1.msk.msra.mxu0 %vm239_vm14, %v5033_v16  ;;  %4720 = vmatpush1.msk.msra.mxu1 %vm241_vm9, %v5033_v16  ;;  %vm176_vm14 = vcmp.eq.s32.totalorder %v5073_v2, %v5446_v41  ;;  %vm178_vm9 = vcmp.eq.s32.totalorder %v5073_v2, %v5450_v42  ;;  %v6324_v42 = vld [vmem:[%s6875_s2 + $0x10] sm:$0xff] }
  0x47   :  { %4683 = vmatmul.mubr.msk.f32.gmra.mxu0 %vm648_vm4, %v5251_v29  ;;  %4698 = vmatmul.mubr.msk.f32.gmra.mxu1 %vm648_vm4, %v5251_v29 }
  0x48   :  { %4706 = vmatprep.subr.msk.mxu0 %vm208_vm11, %v5033_v16  ;;  %4721 = vmatprep.subr.msk.mxu1 %vm210_vm7, %v5033_v16  ;;  %vm177_vm7 = vcmp.eq.s32.totalorder %v5073_v2, %v5468_v44  ;;  %vm6883_vm11 = vcmp.eq.s32.totalorder %v5079_v4, %v5359_v38 }
  0x49   :  { %1132 = vmatprep.mubr.f32.mxu0 %v5032_v1  ;;  %1227 = vmatprep.mubr.f32.mxu1 %v5032_v1 }
  0x4a   :  { %4707 = vmatpush1.msk.msra.mxu0 %vm207_vm1, %v5033_v16  ;;  %4722 = vmatpush1.msk.msra.mxu1 %vm209_vm2, %v5033_v16  ;;  %vm6881_vm1 = vcmp.eq.s32.totalorder %v5079_v4, %v5280_v32  ;;  %vm6884_vm2 = vcmp.eq.s32.totalorder %v5079_v4, %v5363_v39 }
  0x4b   :  { %4684 = vmatmul.mubr.msk.f32.gmra.mxu0 %vm648_vm4, %v5287_v33  ;;  %4699 = vmatmul.mubr.msk.f32.gmra.mxu1 %vm648_vm4, %v5287_v33 }
  0x4c   :  { %4708 = vmatprep.subr.msk.mxu0 %vm176_vm14, %v5033_v16  ;;  %4723 = vmatprep.subr.msk.mxu1 %vm178_vm9, %v5033_v16  ;;  %vm6885_vm14 = vcmp.eq.s32.totalorder %v5094_v9, %v5280_v32  ;;  %vm6886_vm9 = vcmp.eq.s32.totalorder %v5094_v9, %v5355_v37 }
  0x4d   :  { %4709 = vmatpush1.msk.msra.mxu0 %vm175_vm12, %v5033_v16  ;;  %1298 = vmatprep.mubr.f32.mxu0 %v5032_v1  ;;  %vm6882_vm12 = vcmp.eq.s32.totalorder %v5079_v4, %v5355_v37 }
  0x4e   :  { %4724 = vmatpush1.msk.msra.mxu1 %vm177_vm7, %v5033_v16  ;;  %1393 = vmatprep.mubr.f32.mxu1 %v5032_v1  ;;  %vm6887_vm7 = vcmp.eq.s32.totalorder %v5094_v9, %v5359_v38 }
  0x4f   :  { %4710 = vmatmul.mubr.msk.f32.vlgmr.msra.gmra.mxu0 %vm648_vm4, %v5171_v25  ;;  %4725 = vmatmul.mubr.msk.f32.vlgmr.msra.gmra.mxu1 %vm648_vm4, %v5171_v25 }
  0x50   :  { %4730 = vmatprep.subr.msk.mxu0 %vm6881_vm1, %v5033_v16  ;;  %4745 = vmatprep.subr.msk.mxu1 %vm6882_vm12, %v5033_v16  ;;  %vm6888_vm1 = vcmp.eq.s32.totalorder %v5094_v9, %v5363_v39  ;;  %vm6889_vm12 = vcmp.eq.s32.totalorder %v5100_v13, %v5280_v32 }
  0x51   :  { %1304 = vmatprep.mubr.f32.mxu0 %v5032_v1  ;;  %1399 = vmatprep.mubr.f32.mxu1 %v5032_v1 }
  0x52   :  { %4731 = vmatpush1.msk.msra.mxu0 %vm6883_vm11, %v5033_v16  ;;  %4746 = vmatpush1.msk.msra.mxu1 %vm6884_vm2, %v5033_v16  ;;  %vm6890_vm11 = vcmp.eq.s32.totalorder %v5100_v13, %v5355_v37  ;;  %vm6891_vm2 = vcmp.eq.s32.totalorder %v5100_v13, %v5359_v38 }
  0x53   :  { %4711 = vmatmul.mubr.msk.f32.gmra.mxu0 %vm648_vm4, %v5200_v26  ;;  %4726 = vmatmul.mubr.msk.f32.gmra.mxu1 %vm648_vm4, %v5200_v26 }
  0x54   :  { %4732 = vmatprep.subr.msk.mxu0 %vm6885_vm14, %v5033_v16  ;;  %4747 = vmatprep.subr.msk.mxu1 %vm6886_vm9, %v5033_v16  ;;  %vm6892_vm14 = vcmp.eq.s32.totalorder %v5100_v13, %v5363_v39  ;;  %vm6893_vm9 = vcmp.eq.s32.totalorder %v5104_v15, %v5280_v32 }
  0x55   :  { %1310 = vmatprep.mubr.f32.mxu0 %v5032_v1  ;;  %1405 = vmatprep.mubr.f32.mxu1 %v5032_v1 }
  0x56   :  { %4733 = vmatpush1.msk.msra.mxu0 %vm6887_vm7, %v5033_v16  ;;  %4748 = vmatpush1.msk.msra.mxu1 %vm6888_vm1, %v5033_v16  ;;  %vm6894_vm7 = vcmp.eq.s32.totalorder %v5104_v15, %v5355_v37  ;;  %vm180_vm1 = vcmp.eq.s32.totalorder %v5073_v2, %v5280_v32 }
  0x57   :  { %4712 = vmatmul.mubr.msk.f32.gmra.mxu0 %vm648_vm4, %v5223_v27  ;;  %4727 = vmatmul.mubr.msk.f32.gmra.mxu1 %vm648_vm4, %v5223_v27 }
  0x58   :  { %4734 = vmatprep.subr.msk.mxu0 %vm6889_vm12, %v5033_v16  ;;  %4749 = vmatprep.subr.msk.mxu1 %vm6890_vm11, %v5033_v16  ;;  %vm182_vm12 = vcmp.eq.s32.totalorder %v5073_v2, %v5355_v37  ;;  %vm6895_vm11 = vcmp.eq.s32.totalorder %v5104_v15, %v5359_v38 }
  0x59   :  { %1316 = vmatprep.mubr.f32.mxu0 %v5032_v1  ;;  %1411 = vmatprep.mubr.f32.mxu1 %v5032_v1 }
  0x5a   :  { %4735 = vmatpush1.msk.msra.mxu0 %vm6891_vm2, %v5033_v16  ;;  %4750 = vmatpush1.msk.msra.mxu1 %vm6892_vm14, %v5033_v16  ;;  %vm6896_vm2 = vcmp.eq.s32.totalorder %v5104_v15, %v5363_v39  ;;  %vm179_vm14 = vcmp.eq.s32.totalorder %v5073_v2, %v5359_v38  ;;  %v3639_v38 = vld [vmem:[%s6876_s4 + $0x8] sm:$0xff] }
  0x5b   :  { %4713 = vmatmul.mubr.msk.f32.gmra.mxu0 %vm648_vm4, %v5251_v29  ;;  %4728 = vmatmul.mubr.msk.f32.gmra.mxu1 %vm648_vm4, %v5251_v29 }
  0x5c   :  { %4736 = vmatprep.subr.msk.mxu0 %vm6893_vm9, %v5033_v16  ;;  %4751 = vmatprep.subr.msk.mxu1 %vm6894_vm7, %v5033_v16  ;;  %vm181_vm9 = vcmp.eq.s32.totalorder %v5073_v2, %v5363_v39  ;;  %vm6897_vm7 = vcmp.eq.s32.totalorder %v5079_v4, %v5472_v45  ;;  %v3640_v39 = vld [vmem:[%s6876_s4 + $0x10] sm:$0xff] }
  0x5d   :  { %1322 = vmatprep.mubr.f32.mxu0 %v5032_v1  ;;  %1417 = vmatprep.mubr.f32.mxu1 %v5032_v1 }
  0x5e   :  { %4737 = vmatpush1.msk.msra.mxu0 %vm6895_vm11, %v5033_v16  ;;  %4752 = vmatpush1.msk.msra.mxu1 %vm6896_vm2, %v5033_v16  ;;  %vm6900_vm11 = vcmp.eq.s32.totalorder %v5079_v4, %v5490_v48  ;;  %vm6901_vm2 = vcmp.eq.s32.totalorder %v5094_v9, %v5472_v45 }
  0x5f   :  { %4714 = vmatmul.mubr.msk.f32.gmra.mxu0 %vm648_vm4, %v5287_v33  ;;  %4729 = vmatmul.mubr.msk.f32.gmra.mxu1 %vm648_vm4, %v5287_v33 }
  0x60   :  { %4738 = vmatprep.subr.msk.mxu0 %vm180_vm1, %v5033_v16  ;;  %4753 = vmatprep.subr.msk.mxu1 %vm182_vm12, %v5033_v16  ;;  %vm6898_vm1 = vcmp.eq.s32.totalorder %v5079_v4, %v5476_v46  ;;  %vm6899_vm12 = vcmp.eq.s32.totalorder %v5079_v4, %v5486_v47 }
  0x61   :  { %4739 = vmatpush1.msk.msra.mxu0 %vm179_vm14, %v5033_v16  ;;  %1488 = vmatprep.mubr.f32.mxu0 %v5032_v1  ;;  %vm6902_vm14 = vcmp.eq.s32.totalorder %v5094_v9, %v5486_v47 }
  0x62   :  { %4754 = vmatpush1.msk.msra.mxu1 %vm181_vm9, %v5033_v16  ;;  %1583 = vmatprep.mubr.f32.mxu1 %v5032_v1  ;;  %vm6904_vm9 = vcmp.eq.s32.totalorder %v5100_v13, %v5476_v46 }
  0x63   :  { %4740 = vmatmul.mubr.msk.f32.vlgmr.msra.gmra.mxu0 %vm648_vm4, %v5171_v25  ;;  %4755 = vmatmul.mubr.msk.f32.vlgmr.msra.gmra.mxu1 %vm648_vm4, %v5171_v25 }
  0x64   :  { %4760 = vmatprep.subr.msk.mxu0 %vm6897_vm7, %v5033_v16  ;;  %4775 = vmatprep.subr.msk.mxu1 %vm6898_vm1, %v5033_v16  ;;  %vm6906_vm7 = vcmp.eq.s32.totalorder %v5100_v13, %v5490_v48  ;;  %vm6907_vm1 = vcmp.eq.s32.totalorder %v5104_v15, %v5472_v45 }
  0x65   :  { %1494 = vmatprep.mubr.f32.mxu0 %v5032_v1  ;;  %1589 = vmatprep.mubr.f32.mxu1 %v5032_v1 }
  0x66   :  { %4761 = vmatpush1.msk.msra.mxu0 %vm6899_vm12, %v5033_v16  ;;  %4776 = vmatpush1.msk.msra.mxu1 %vm6900_vm11, %v5033_v16  ;;  %vm6908_vm12 = vcmp.eq.s32.totalorder %v5104_v15, %v5476_v46  ;;  %vm184_vm11 = vcmp.eq.s32.totalorder %v5073_v2, %v5472_v45 }
  0x67   :  { %4741 = vmatmul.mubr.msk.f32.gmra.mxu0 %vm648_vm4, %v5200_v26  ;;  %4756 = vmatmul.mubr.msk.f32.gmra.mxu1 %vm648_vm4, %v5200_v26 }
  0x68   :  { %4762 = vmatprep.subr.msk.mxu0 %vm6901_vm2, %v5033_v16  ;;  %4777 = vmatprep.subr.msk.mxu1 %vm282_vm5, %v5033_v16  ;;  %vm6903_vm5 = vcmp.eq.s32.totalorder %v5100_v13, %v5472_v45  ;;  %vm186_vm2 = vcmp.eq.s32.totalorder %v5073_v2, %v5476_v46 }
  0x69   :  { %1500 = vmatprep.mubr.f32.mxu0 %v5032_v1  ;;  %1595 = vmatprep.mubr.f32.mxu1 %v5032_v1 }
  0x6a   :  { %4763 = vmatpush1.msk.msra.mxu0 %vm6902_vm14, %v5033_v16  ;;  %4778 = vmatpush1.msk.msra.mxu1 %vm281_vm3, %v5033_v16  ;;  %vm6905_vm3 = vcmp.eq.s32.totalorder %v5100_v13, %v5486_v47  ;;  %vm6909_vm14 = vcmp.eq.s32.totalorder %v5104_v15, %v5486_v47 }
  0x6b   :  { %4742 = vmatmul.mubr.msk.f32.gmra.mxu0 %vm648_vm4, %v5223_v27  ;;  %4757 = vmatmul.mubr.msk.f32.gmra.mxu1 %vm648_vm4, %v5223_v27 }
  0x6c   :  { %4764 = vmatprep.subr.msk.mxu0 %vm6903_vm5, %v5033_v16  ;;  %4779 = vmatprep.subr.msk.mxu1 %vm6904_vm9, %v5033_v16  ;;  %vm6910_vm5 = vcmp.eq.s32.totalorder %v5104_v15, %v5490_v48  ;;  %vm183_vm9 = vcmp.eq.s32.totalorder %v5073_v2, %v5486_v47 }
  0x6d   :  { %1506 = vmatprep.mubr.f32.mxu0 %v5032_v1  ;;  %1601 = vmatprep.mubr.f32.mxu1 %v5032_v1 }
  0x6e   :  { %4765 = vmatpush1.msk.msra.mxu0 %vm6905_vm3, %v5033_v16  ;;  %4780 = vmatpush1.msk.msra.mxu1 %vm6906_vm7, %v5033_v16  ;;  %vm185_vm3 = vcmp.eq.s32.totalorder %v5073_v2, %v5490_v48  ;;  %vm6911_vm7 = vcmp.eq.s32.totalorder %v5079_v4, %v5494_v49 }
  0x6f   :  { %4743 = vmatmul.mubr.msk.f32.gmra.mxu0 %vm648_vm4, %v5251_v29  ;;  %4758 = vmatmul.mubr.msk.f32.gmra.mxu1 %vm648_vm4, %v5251_v29 }
  0x70   :  { %4766 = vmatprep.subr.msk.mxu0 %vm6907_vm1, %v5033_v16  ;;  %4781 = vmatprep.subr.msk.mxu1 %vm6908_vm12, %v5033_v16  ;;  %vm6912_vm1 = vcmp.eq.s32.totalorder %v5079_v4, %v5594_v51  ;;  %vm6913_vm12 = vcmp.eq.s32.totalorder %v5079_v4, %v5598_v52 }
  0x71   :  { %1512 = vmatprep.mubr.f32.mxu0 %v5032_v1  ;;  %1607 = vmatprep.mubr.f32.mxu1 %v5032_v1 }
  0x72   :  { %4767 = vmatpush1.msk.msra.mxu0 %vm6909_vm14, %v5033_v16  ;;  %4782 = vmatpush1.msk.msra.mxu1 %vm6910_vm5, %v5033_v16  ;;  %vm6917_vm14 = vcmp.eq.s32.totalorder %v5094_v9, %v5598_v52  ;;  %vm6918_vm5 = vcmp.eq.s32.totalorder %v5100_v13, %v5494_v49 }
  0x73   :  { %4744 = vmatmul.mubr.msk.f32.gmra.mxu0 %vm648_vm4, %v5287_v33  ;;  %4759 = vmatmul.mubr.msk.f32.gmra.mxu1 %vm648_vm4, %v5287_v33 }
  0x74   :  { %4768 = vmatprep.subr.msk.mxu0 %vm184_vm11, %v5033_v16  ;;  %4783 = vmatprep.subr.msk.mxu1 %vm186_vm2, %v5033_v16  ;;  %vm6915_vm11 = vcmp.eq.s32.totalorder %v5094_v9, %v5590_v50  ;;  %vm6916_vm2 = vcmp.eq.s32.totalorder %v5094_v9, %v5594_v51 }
  0x75   :  { %4769 = vmatpush1.msk.msra.mxu0 %vm183_vm9, %v5033_v16  ;;  %1678 = vmatprep.mubr.f32.mxu0 %v5032_v1  ;;  %vm6919_vm9 = vcmp.eq.s32.totalorder %v5100_v13, %v5590_v50 }
  0x76   :  { %4784 = vmatpush1.msk.msra.mxu1 %vm185_vm3, %v5033_v16  ;;  %1773 = vmatprep.mubr.f32.mxu1 %v5032_v1  ;;  %vm6920_vm3 = vcmp.eq.s32.totalorder %v5100_v13, %v5594_v51 }
  0x77   :  { %4770 = vmatmul.mubr.msk.f32.vlgmr.msra.gmra.mxu0 %vm648_vm4, %v5171_v25  ;;  %4785 = vmatmul.mubr.msk.f32.vlgmr.msra.gmra.mxu1 %vm648_vm4, %v5171_v25 }
  0x78   :  { %4790 = vmatprep.subr.msk.mxu0 %vm6911_vm7, %v5033_v16  ;;  %4805 = vmatprep.subr.msk.mxu1 %vm318_vm13, %v5033_v16  ;;  %vm6914_vm13 = vcmp.eq.s32.totalorder %v5094_v9, %v5494_v49  ;;  %vm6921_vm7 = vcmp.eq.s32.totalorder %v5100_v13, %v5598_v52 }
  0x79   :  { %1684 = vmatprep.mubr.f32.mxu0 %v5032_v1  ;;  %1779 = vmatprep.mubr.f32.mxu1 %v5032_v1 }
  0x7a   :  { %4791 = vmatpush1.msk.msra.mxu0 %vm6912_vm1, %v5033_v16  ;;  %4806 = vmatpush1.msk.msra.mxu1 %vm6913_vm12, %v5033_v16  ;;  %vm6922_vm1 = vcmp.eq.s32.totalorder %v5104_v15, %v5494_v49  ;;  %vm6923_vm12 = vcmp.eq.s32.totalorder %v5104_v15, %v5590_v50 }
  0x7b   :  { %4771 = vmatmul.mubr.msk.f32.gmra.mxu0 %vm648_vm4, %v5200_v26  ;;  %4786 = vmatmul.mubr.msk.f32.gmra.mxu1 %vm648_vm4, %v5200_v26 }
  0x7c   :  { %4792 = vmatprep.subr.msk.mxu0 %vm6914_vm13, %v5033_v16  ;;  %4807 = vmatprep.subr.msk.mxu1 %vm6915_vm11, %v5033_v16  ;;  %vm188_vm13 = vcmp.eq.s32.totalorder %v5073_v2, %v5494_v49  ;;  %vm190_vm11 = vcmp.eq.s32.totalorder %v5073_v2, %v5590_v50 }
  0x7d   :  { %1690 = vmatprep.mubr.f32.mxu0 %v5032_v1  ;;  %1785 = vmatprep.mubr.f32.mxu1 %v5032_v1 }
  0x7e   :  { %4793 = vmatpush1.msk.msra.mxu0 %vm6916_vm2, %v5033_v16  ;;  %4808 = vmatpush1.msk.msra.mxu1 %vm6917_vm14, %v5033_v16  ;;  %vm6924_vm2 = vcmp.eq.s32.totalorder %v5104_v15, %v5594_v51  ;;  %vm6925_vm14 = vcmp.eq.s32.totalorder %v5104_v15, %v5598_v52 }
  0x7f   :  { %4772 = vmatmul.mubr.msk.f32.gmra.mxu0 %vm648_vm4, %v5223_v27  ;;  %4787 = vmatmul.mubr.msk.f32.gmra.mxu1 %vm648_vm4, %v5223_v27 }
  0x80   :  { %4794 = vmatprep.subr.msk.mxu0 %vm6918_vm5, %v5033_v16  ;;  %4809 = vmatprep.subr.msk.mxu1 %vm6919_vm9, %v5033_v16  ;;  %vm187_vm5 = vcmp.eq.s32.totalorder %v5073_v2, %v5594_v51  ;;  %vm189_vm9 = vcmp.eq.s32.totalorder %v5073_v2, %v5598_v52 }
  0x81   :  { %1696 = vmatprep.mubr.f32.mxu0 %v5032_v1  ;;  %1791 = vmatprep.mubr.f32.mxu1 %v5032_v1 }
  0x82   :  { %4795 = vmatpush1.msk.msra.mxu0 %vm6920_vm3, %v5033_v16  ;;  %4810 = vmatpush1.msk.msra.mxu1 %vm6921_vm7, %v5033_v16  ;;  %vm6926_vm3 = vcmp.eq.s32.totalorder %v5079_v4, %v5694_v55  ;;  %vm6927_vm7 = vcmp.eq.s32.totalorder %v5079_v4, %v5698_v56 }
  0x83   :  { %4773 = vmatmul.mubr.msk.f32.gmra.mxu0 %vm648_vm4, %v5251_v29  ;;  %4788 = vmatmul.mubr.msk.f32.gmra.mxu1 %vm648_vm4, %v5251_v29 }
  0x84   :  { %4796 = vmatprep.subr.msk.mxu0 %vm6922_vm1, %v5033_v16  ;;  %4811 = vmatprep.subr.msk.mxu1 %vm6923_vm12, %v5033_v16  ;;  %vm6931_vm1 = vcmp.eq.s32.totalorder %v5100_v13, %v5684_v54  ;;  %vm6933_vm12 = vcmp.eq.s32.totalorder %v5100_v13, %v5698_v56 }
  0x85   :  { %1702 = vmatprep.mubr.f32.mxu0 %v5032_v1  ;;  %1797 = vmatprep.mubr.f32.mxu1 %v5032_v1 }
  0x86   :  { %4797 = vmatpush1.msk.msra.mxu0 %vm6924_vm2, %v5033_v16  ;;  %4812 = vmatpush1.msk.msra.mxu1 %vm6925_vm14, %v5033_v16  ;;  %vm194_vm2 = vcmp.eq.s32.totalorder %v5073_v2, %v5684_v54  ;;  %vm6935_vm14 = vcmp.eq.s32.totalorder %v5104_v15, %v5694_v55 }
  0x87   :  { %4774 = vmatmul.mubr.msk.f32.gmra.mxu0 %vm648_vm4, %v5287_v33  ;;  %4789 = vmatmul.mubr.msk.f32.gmra.mxu1 %vm648_vm4, %v5287_v33 }
  0x88   :  { %4798 = vmatprep.subr.msk.mxu0 %vm188_vm13, %v5033_v16  ;;  %4813 = vmatprep.subr.msk.mxu1 %vm190_vm11, %v5033_v16  ;;  %vm6934_vm13 = vcmp.eq.s32.totalorder %v5104_v15, %v5684_v54  ;;  %vm192_vm11 = vcmp.eq.s32.totalorder %v5073_v2, %v5680_v53 }
  0x89   :  { %4799 = vmatpush1.msk.msra.mxu0 %vm187_vm5, %v5033_v16  ;;  %1868 = vmatprep.mubr.f32.mxu0 %v5032_v1  ;;  %vm191_vm5 = vcmp.eq.s32.totalorder %v5073_v2, %v5694_v55 }
  0x8a   :  { %4814 = vmatpush1.msk.msra.mxu1 %vm189_vm9, %v5033_v16  ;;  %1963 = vmatprep.mubr.f32.mxu1 %v5032_v1  ;;  %vm193_vm9 = vcmp.eq.s32.totalorder %v5073_v2, %v5698_v56 }
  0x8b   :  { %4800 = vmatmul.mubr.msk.f32.vlgmr.msra.gmra.mxu0 %vm648_vm4, %v5171_v25  ;;  %4815 = vmatmul.mubr.msk.f32.vlgmr.msra.gmra.mxu1 %vm648_vm4, %v5171_v25 }
  0x8c   :  { %4820 = vmatprep.subr.msk.mxu0 %vm320_vm10, %v5033_v16  ;;  %4835 = vmatprep.subr.msk.mxu1 %vm322_vm0, %v5033_v16  ;;  %vm6928_vm0 = vcmp.eq.s32.totalorder %v5094_v9, %v5680_v53  ;;  %vm6929_vm10 = vcmp.eq.s32.totalorder %v5094_v9, %v5694_v55 }
  0x8d   :  { %1874 = vmatprep.mubr.f32.mxu0 %v5032_v1  ;;  %1969 = vmatprep.mubr.f32.mxu1 %v5032_v1 }
  0x8e   :  { %4821 = vmatpush1.msk.msra.mxu0 %vm6926_vm3, %v5033_v16  ;;  %4836 = vmatpush1.msk.msra.mxu1 %vm6927_vm7, %v5033_v16 }
  0x8f   :  { %4801 = vmatmul.mubr.msk.f32.gmra.mxu0 %vm648_vm4, %v5200_v26  ;;  %4816 = vmatmul.mubr.msk.f32.gmra.mxu1 %vm648_vm4, %v5200_v26 }
  0x90   :  { %4822 = vmatprep.subr.msk.mxu0 %vm6928_vm0, %v5033_v16  ;;  %4837 = vmatprep.subr.msk.mxu1 %vm290_vm6, %v5033_v16  ;;  %vm6930_vm6 = vcmp.eq.s32.totalorder %v5100_v13, %v5680_v53 }
  0x91   :  { %1880 = vmatprep.mubr.f32.mxu0 %v5032_v1  ;;  %1975 = vmatprep.mubr.f32.mxu1 %v5032_v1 }
  0x92   :  { %4823 = vmatpush1.msk.msra.mxu0 %vm6929_vm10, %v5033_v16  ;;  %4838 = vmatpush1.msk.msra.mxu1 %vm289_vm8, %v5033_v16  ;;  %vm6932_vm8 = vcmp.eq.s32.totalorder %v5100_v13, %v5694_v55  ;;  %v2187_v13 = vld [vmem:[%s6874_s3] sm:$0xff] }
  0x93   :  { %4802 = vmatmul.mubr.msk.f32.gmra.mxu0 %vm648_vm4, %v5223_v27  ;;  %4817 = vmatmul.mubr.msk.f32.gmra.mxu1 %vm648_vm4, %v5223_v27 }
  0x94   :  { %4824 = vmatprep.subr.msk.mxu0 %vm6930_vm6, %v5033_v16  ;;  %4839 = vmatprep.subr.msk.mxu1 %vm6931_vm1, %v5033_v16 }
  0x95   :  { %1886 = vmatprep.mubr.f32.mxu0 %v5032_v1  ;;  %1981 = vmatprep.mubr.f32.mxu1 %v5032_v1 }
  0x96   :  { %4825 = vmatpush1.msk.msra.mxu0 %vm6932_vm8, %v5033_v16  ;;  %4840 = vmatpush1.msk.msra.mxu1 %vm6933_vm12, %v5033_v16 }
  0x97   :  { %4803 = vmatmul.mubr.msk.f32.gmra.mxu0 %vm648_vm4, %v5251_v29  ;;  %4818 = vmatmul.mubr.msk.f32.gmra.mxu1 %vm648_vm4, %v5251_v29 }
  0x98   :  { %4826 = vmatprep.subr.msk.mxu0 %vm224_vm15, %v5033_v16  ;;  %4841 = vmatprep.subr.msk.mxu1 %vm6934_vm13, %v5033_v16  ;;  %vm6936_vm15 = vcmp.eq.s32.totalorder %v5104_v15, %v5698_v56 }
  0x99   :  { %1892 = vmatprep.mubr.f32.mxu0 %v5032_v1  ;;  %1987 = vmatprep.mubr.f32.mxu1 %v5032_v1 }
  0x9a   :  { %4827 = vmatpush1.msk.msra.mxu0 %vm6935_vm14, %v5033_v16  ;;  %4842 = vmatpush1.msk.msra.mxu1 %vm6936_vm15, %v5033_v16 }
  0x9b   :  { %4804 = vmatmul.mubr.msk.f32.gmra.mxu0 %vm648_vm4, %v5287_v33  ;;  %4819 = vmatmul.mubr.msk.f32.gmra.mxu1 %vm648_vm4, %v5287_v33 }
  0x9c   :  { %4828 = vmatprep.subr.msk.mxu0 %vm192_vm11, %v5033_v16  ;;  %4843 = vmatprep.subr.msk.mxu1 %vm194_vm2, %v5033_v16 }
  0x9d   :  { %4829 = vmatpush1.msk.msra.mxu0 %vm191_vm5, %v5033_v16  ;;  %2058 = vmatprep.mubr.f32.mxu0 %v5032_v1 }
  0x9e   :  { %4844 = vmatpush1.msk.msra.mxu1 %vm193_vm9, %v5033_v16  ;;  %2153 = vmatprep.mubr.f32.mxu1 %v5032_v1  ;;  %v2189_v16 = vld [vmem:[%s6874_s3 + $0x10] sm:$0xff] }
  0x9f   :  { %4830 = vmatmul.mubr.msk.f32.vlgmr.msra.gmra.mxu0 %vm648_vm4, %v5171_v25  ;;  %4845 = vmatmul.mubr.msk.f32.vlgmr.msra.gmra.mxu1 %vm648_vm4, %v5171_v25 }
  0xa0   :  { %2064 = vmatprep.mubr.f32.mxu0 %v5032_v1  ;;  %2159 = vmatprep.mubr.f32.mxu1 %v5032_v1 }
  0xa1   :  { %4902 = vset.pattern.permute.xlu0 %v5034_v12  ;;  %4903 = vset.pattern.permute.xlu1 %v5034_v12 }
  0xa2   :  { %2192 = vperm.xlu0 %4902, %v2187_v13   ;;  %2202 = vperm.xlu1 %4903, %v2189_v16  }
  0xa3   :  { %4831 = vmatmul.mubr.msk.f32.gmra.mxu0 %vm648_vm4, %v5200_v26  ;;  %4846 = vmatmul.mubr.msk.f32.gmra.mxu1 %vm648_vm4, %v5200_v26 }
  0xa4   :  { %2070 = vmatprep.mubr.f32.mxu0 %v5032_v1  ;;  %2165 = vmatprep.mubr.f32.mxu1 %v5032_v1 }
  0xa6   :  { %2197 = vperm.xlu0 %4902, %v2188_v30   ;;  %3643 = vperm.xlu1 %4903, %v3638_v31  }
  0xa7   :  { %4832 = vmatmul.mubr.msk.f32.gmra.mxu0 %vm648_vm4, %v5223_v27  ;;  %4847 = vmatmul.mubr.msk.f32.gmra.mxu1 %vm648_vm4, %v5223_v27  ;;  %v6287_v27 = vld [vmem:[%s6875_s2] sm:$0xff] }
  0xa8   :  { %2076 = vmatprep.mubr.f32.mxu0 %v5032_v1  ;;  %2171 = vmatprep.mubr.f32.mxu1 %v5032_v1 }
  0xaa   :  { %3648 = vperm.xlu0 %4902, %v3639_v38   ;;  %3653 = vperm.xlu1 %4903, %v3640_v39  }
  0xab   :  { %4833 = vmatmul.mubr.msk.f32.gmra.mxu0 %vm648_vm4, %v5251_v29  ;;  %4848 = vmatmul.mubr.msk.f32.gmra.mxu1 %vm648_vm4, %v5251_v29 }
  0xac   :  { %2082 = vmatprep.mubr.f32.mxu0 %v5032_v1  ;;  %2177 = vmatprep.mubr.f32.mxu1 %v5032_v1 }
  0xaf   :  { %4834 = vmatmul.mubr.msk.f32.gmra.mxu0 %vm648_vm4, %v5287_v33  ;;  %4849 = vmatmul.mubr.msk.f32.gmra.mxu1 %vm648_vm4, %v5287_v33 }
  0xb0   :  { %2278 = vmatprep.mubr.f32.mxu0 %v5032_v1  ;;  %2361 = vmatprep.mubr.f32.mxu1 %v5032_v1 }
  0xd3   :  { %v730_v57 = vpop.f32.mrf.mxu0  ;;  %v825_v58 = vpop.f32.mrf.mxu1 }
  0xd5   :  { %v732_v59 = vpop.f32.mrf.mxu0  ;;  %v827_v60 = vpop.f32.mrf.mxu1 }
  0xd7   :  { %v736_v61 = vpop.f32.mrf.mxu0  ;;  %v831_v62 = vpop.f32.mrf.mxu1 }
  0xd9   :  { %v738_v63 = vpop.f32.mrf.mxu0  ;;  %v833_v0 = vpop.f32.mrf.mxu1 }
  0xdb   :  { %v742_v3 = vpop.f32.mrf.mxu0  ;;  %v837_v4 = vpop.f32.mrf.mxu1 }
  0xdd   :  { %v744_v5 = vpop.f32.mrf.mxu0  ;;  %v839_v6 = vpop.f32.mrf.mxu1 }
  0xdf   :  { %v748_v8 = vpop.f32.mrf.mxu0  ;;  %v843_v9 = vpop.f32.mrf.mxu1 }
  0xe1   :  { %v750_v10 = vpop.f32.mrf.mxu0  ;;  %v845_v11 = vpop.f32.mrf.mxu1 }
  0xe3   :  { %v754_v14 = vpop.f32.mrf.mxu0  ;;  %v849_v15 = vpop.f32.mrf.mxu1 }
  0xe5   :  { %v756_v17 = vpop.f32.mrf.mxu0  ;;  %v851_v18 = vpop.f32.mrf.mxu1 }
  0xe6   :  { %2236 = vmatprep.subr.mxu0 %v756_v17  ;;  %2319 = vmatprep.subr.mxu1 %v851_v18 }
  0xe7   :  { %v6268_v19 = vpop.f32.mrf.mxu0  ;;  %v6270_v20 = vpop.f32.mrf.mxu1  ;;  %2237 = vmatpush1.msra.mxu0 %v754_v14  ;;  %2320 = vmatpush1.msra.mxu1 %v849_v15 }
  0xe8   :  { %2238 = vmatprep.subr.mxu0 %v750_v10  ;;  %2321 = vmatprep.subr.mxu1 %v845_v11 }
  0xe9   :  { %v6272_v21 = vpop.f32.mrf.mxu0  ;;  %v6274_v22 = vpop.f32.mrf.mxu1  ;;  %2239 = vmatpush1.msra.mxu0 %v748_v8  ;;  %2322 = vmatpush1.msra.mxu1 %v843_v9 }
  0xea   :  { %2240 = vmatprep.subr.mxu0 %v744_v5  ;;  %2323 = vmatprep.subr.mxu1 %v839_v6 }
  0xeb   :  { %v6276_v23 = vpop.f32.mrf.mxu0  ;;  %v6278_v24 = vpop.f32.mrf.mxu1  ;;  %2241 = vmatpush1.msra.mxu0 %v742_v3  ;;  %2324 = vmatpush1.msra.mxu1 %v837_v4 }
  0xec   :  { %2242 = vmatprep.subr.mxu0 %v738_v63  ;;  %2325 = vmatprep.subr.mxu1 %v833_v0 }
  0xed   :  { %v6280_v25 = vpop.f32.mrf.mxu0  ;;  %v6282_v26 = vpop.f32.mrf.mxu1  ;;  %2243 = vmatpush1.msra.mxu0 %v736_v61  ;;  %2326 = vmatpush1.msra.mxu1 %v831_v62 }
  0xee   :  { %2244 = vmatprep.subr.mxu0 %v732_v59  ;;  %2327 = vmatprep.subr.mxu1 %v827_v60 }
  0xef   :  { %v932_v28 = vpop.f32.mrf.mxu0  ;;  %v1027_v29 = vpop.f32.mrf.mxu1  ;;  %2245 = vmatpush1.msra.mxu0 %v730_v57  ;;  %2328 = vmatpush1.msra.mxu1 %v825_v58  ;;  %v4008_v57 = vld [vmem:[#allocation2] sm:$0x1] }
  0xf0   :  { %4850 = vmatmul.mubr.msk.f32.vlgmr.msra.gmra.mxu0 %vm648_vm4, %v6287_v27  ;;  %4853 = vmatmul.mubr.msk.f32.vlgmr.msra.gmra.mxu1 %vm648_vm4, %v6287_v27 }
  0xf1   :  { %v934_v32 = vpop.f32.mrf.mxu0  ;;  %v1029_v33 = vpop.f32.mrf.mxu1  ;;  %2284 = vmatprep.mubr.f32.mxu0 %v5032_v1  ;;  %2367 = vmatprep.mubr.f32.mxu1 %v5032_v1 }
  0xf2   :  { %4011 = vperm.xlu0 %4902, %v4008_v57  }
  0xf3   :  { %v938_v36 = vpop.f32.mrf.mxu0  ;;  %v1033_v37 = vpop.f32.mrf.mxu1 }
  0xf4   :  { %4851 = vmatmul.mubr.msk.f32.gmra.mxu0 %vm648_vm4, %v6304_v34  ;;  %4854 = vmatmul.mubr.msk.f32.gmra.mxu1 %vm648_vm4, %v6304_v34 }
  0xf5   :  { %v940_v40 = vpop.f32.mrf.mxu0  ;;  %v1035_v41 = vpop.f32.mrf.mxu1  ;;  %2290 = vmatprep.mubr.f32.mxu0 %v5032_v1  ;;  %2373 = vmatprep.mubr.f32.mxu1 %v5032_v1 }
  0xf7   :  { %v944_v43 = vpop.f32.mrf.mxu0  ;;  %v1039_v44 = vpop.f32.mrf.mxu1 }
  0xf8   :  { %4852 = vmatmul.mubr.msk.f32.gmra.mxu0 %vm648_vm4, %v6324_v42  ;;  %4855 = vmatmul.mubr.msk.f32.gmra.mxu1 %vm648_vm4, %v6324_v42 }
  0xf9   :  { %v946_v45 = vpop.f32.mrf.mxu0  ;;  %v1041_v46 = vpop.f32.mrf.mxu1  ;;  %2444 = vmatprep.mubr.f32.mxu0 %v5032_v1  ;;  %2527 = vmatprep.mubr.f32.mxu1 %v5032_v1 }
  0xfa   :  { %2402 = vmatprep.subr.mxu0 %v946_v45  ;;  %2485 = vmatprep.subr.mxu1 %v1041_v46 }
  0xfb   :  { %v6332_v47 = vpop.f32.mrf.mxu0  ;;  %v6334_v48 = vpop.f32.mrf.mxu1  ;;  %2403 = vmatpush1.msra.mxu0 %v944_v43  ;;  %2486 = vmatpush1.msra.mxu1 %v1039_v44 }
  0xfc   :  { %2404 = vmatprep.subr.mxu0 %v940_v40  ;;  %2487 = vmatprep.subr.mxu1 %v1035_v41 }
  0xfd   :  { %v6336_v49 = vpop.f32.mrf.mxu0  ;;  %v6338_v50 = vpop.f32.mrf.mxu1  ;;  %2405 = vmatpush1.msra.mxu0 %v938_v36  ;;  %2488 = vmatpush1.msra.mxu1 %v1033_v37 }
  0xfe   :  { %2406 = vmatprep.subr.mxu0 %v934_v32  ;;  %2489 = vmatprep.subr.mxu1 %v1029_v33 }
  0xff   :  { %v1116_v51 = vpop.f32.mrf.mxu0  ;;  %v1211_v52 = vpop.f32.mrf.mxu1  ;;  %2407 = vmatpush1.msra.mxu0 %v932_v28  ;;  %2490 = vmatpush1.msra.mxu1 %v1027_v29 }
 0x100   :  { %2408 = vmatprep.subr.mxu0 %v6280_v25  ;;  %2491 = vmatprep.subr.mxu1 %v6282_v26 }
 0x101   :  { %v1118_v53 = vpop.f32.mrf.mxu0  ;;  %v1213_v54 = vpop.f32.mrf.mxu1  ;;  %2409 = vmatpush1.msra.mxu0 %v6276_v23  ;;  %2492 = vmatpush1.msra.mxu1 %v6278_v24 }
 0x102   :  { %2410 = vmatprep.subr.mxu0 %v6272_v21  ;;  %2493 = vmatprep.subr.mxu1 %v6274_v22 }
 0x103   :  { %v1122_v55 = vpop.f32.mrf.mxu0  ;;  %v1217_v56 = vpop.f32.mrf.mxu1  ;;  %2411 = vmatpush1.msra.mxu0 %v6268_v19  ;;  %2494 = vmatpush1.msra.mxu1 %v6270_v20 }
 0x104   :  { %4856 = vmatmul.mubr.msk.f32.vlgmr.msra.gmra.mxu0 %vm648_vm4, %v6287_v27  ;;  %4859 = vmatmul.mubr.msk.f32.vlgmr.msra.gmra.mxu1 %vm648_vm4, %v6287_v27 }
 0x105   :  { %v1124_v58 = vpop.f32.mrf.mxu0  ;;  %v1219_v59 = vpop.f32.mrf.mxu1  ;;  %2450 = vmatprep.mubr.f32.mxu0 %v5032_v1  ;;  %2533 = vmatprep.mubr.f32.mxu1 %v5032_v1 }
 0x107   :  { %v1128_v60 = vpop.f32.mrf.mxu0  ;;  %v1223_v61 = vpop.f32.mrf.mxu1 }
 0x108   :  { %4857 = vmatmul.mubr.msk.f32.gmra.mxu0 %vm648_vm4, %v6304_v34  ;;  %4860 = vmatmul.mubr.msk.f32.gmra.mxu1 %vm648_vm4, %v6304_v34 }
 0x109   :  { %v1130_v62 = vpop.f32.mrf.mxu0  ;;  %v1225_v63 = vpop.f32.mrf.mxu1  ;;  %2456 = vmatprep.mubr.f32.mxu0 %v5032_v1  ;;  %2539 = vmatprep.mubr.f32.mxu1 %v5032_v1 }
 0x10b   :  { %v1134_v0 = vpop.f32.mrf.mxu0  ;;  %v1229_v3 = vpop.f32.mrf.mxu1 }
 0x10c   :  { %4858 = vmatmul.mubr.msk.f32.gmra.mxu0 %vm648_vm4, %v6324_v42  ;;  %4861 = vmatmul.mubr.msk.f32.gmra.mxu1 %vm648_vm4, %v6324_v42 }
 0x10d   :  { %v1136_v4 = vpop.f32.mrf.mxu0  ;;  %v1231_v5 = vpop.f32.mrf.mxu1  ;;  %2610 = vmatprep.mubr.f32.mxu0 %v5032_v1  ;;  %2693 = vmatprep.mubr.f32.mxu1 %v5032_v1 }
 0x10e   :  { %2568 = vmatprep.subr.mxu0 %v1136_v4  ;;  %2651 = vmatprep.subr.mxu1 %v1231_v5 }
 0x10f   :  { %v6366_v6 = vpop.f32.mrf.mxu0  ;;  %v6368_v8 = vpop.f32.mrf.mxu1  ;;  %2569 = vmatpush1.msra.mxu0 %v1134_v0  ;;  %2652 = vmatpush1.msra.mxu1 %v1229_v3 }
 0x110   :  { %2570 = vmatprep.subr.mxu0 %v1130_v62  ;;  %2653 = vmatprep.subr.mxu1 %v1225_v63 }
 0x111   :  { %v6370_v9 = vpop.f32.mrf.mxu0  ;;  %v6372_v10 = vpop.f32.mrf.mxu1  ;;  %2571 = vmatpush1.msra.mxu0 %v1128_v60  ;;  %2654 = vmatpush1.msra.mxu1 %v1223_v61 }
 0x112   :  { %2572 = vmatprep.subr.mxu0 %v1124_v58  ;;  %2655 = vmatprep.subr.mxu1 %v1219_v59 }
 0x113   :  { %v1306_v11 = vpop.f32.mrf.mxu0  ;;  %v1401_v12 = vpop.f32.mrf.mxu1  ;;  %2573 = vmatpush1.msra.mxu0 %v1122_v55  ;;  %2656 = vmatpush1.msra.mxu1 %v1217_v56 }
 0x114   :  { %2574 = vmatprep.subr.mxu0 %v1118_v53  ;;  %2657 = vmatprep.subr.mxu1 %v1213_v54 }
 0x115   :  { %v1308_v13 = vpop.f32.mrf.mxu0  ;;  %v1403_v14 = vpop.f32.mrf.mxu1  ;;  %2575 = vmatpush1.msra.mxu0 %v1116_v51  ;;  %2658 = vmatpush1.msra.mxu1 %v1211_v52 }
 0x116   :  { %2576 = vmatprep.subr.mxu0 %v6336_v49  ;;  %2659 = vmatprep.subr.mxu1 %v6338_v50 }
 0x117   :  { %v1312_v15 = vpop.f32.mrf.mxu0  ;;  %v1407_v16 = vpop.f32.mrf.mxu1  ;;  %2577 = vmatpush1.msra.mxu0 %v6332_v47  ;;  %2660 = vmatpush1.msra.mxu1 %v6334_v48 }
 0x118   :  { %4862 = vmatmul.mubr.msk.f32.vlgmr.msra.gmra.mxu0 %vm648_vm4, %v6287_v27  ;;  %4865 = vmatmul.mubr.msk.f32.vlgmr.msra.gmra.mxu1 %vm648_vm4, %v6287_v27 }
 0x119   :  { %v1314_v17 = vpop.f32.mrf.mxu0  ;;  %v1409_v18 = vpop.f32.mrf.mxu1  ;;  %2616 = vmatprep.mubr.f32.mxu0 %v5032_v1  ;;  %2699 = vmatprep.mubr.f32.mxu1 %v5032_v1 }
 0x11b   :  { %v1318_v19 = vpop.f32.mrf.mxu0  ;;  %v1413_v20 = vpop.f32.mrf.mxu1 }
 0x11c   :  { %4863 = vmatmul.mubr.msk.f32.gmra.mxu0 %vm648_vm4, %v6304_v34  ;;  %4866 = vmatmul.mubr.msk.f32.gmra.mxu1 %vm648_vm4, %v6304_v34 }
 0x11d   :  { %v1320_v21 = vpop.f32.mrf.mxu0  ;;  %v1415_v22 = vpop.f32.mrf.mxu1  ;;  %2622 = vmatprep.mubr.f32.mxu0 %v5032_v1  ;;  %2705 = vmatprep.mubr.f32.mxu1 %v5032_v1 }
 0x11f   :  { %v1324_v23 = vpop.f32.mrf.mxu0  ;;  %v1419_v24 = vpop.f32.mrf.mxu1 }
 0x120   :  { %4864 = vmatmul.mubr.msk.f32.gmra.mxu0 %vm648_vm4, %v6324_v42  ;;  %4867 = vmatmul.mubr.msk.f32.gmra.mxu1 %vm648_vm4, %v6324_v42 }
 0x121   :  { %v1326_v25 = vpop.f32.mrf.mxu0  ;;  %v1421_v26 = vpop.f32.mrf.mxu1  ;;  %2776 = vmatprep.mubr.f32.mxu0 %v5032_v1  ;;  %2859 = vmatprep.mubr.f32.mxu1 %v5032_v1 }
 0x122   :  { %2734 = vmatprep.subr.mxu0 %v1326_v25  ;;  %2817 = vmatprep.subr.mxu1 %v1421_v26 }
 0x123   :  { %v6396_v28 = vpop.f32.mrf.mxu0  ;;  %v6398_v29 = vpop.f32.mrf.mxu1  ;;  %2735 = vmatpush1.msra.mxu0 %v1324_v23  ;;  %2818 = vmatpush1.msra.mxu1 %v1419_v24 }
 0x124   :  { %2736 = vmatprep.subr.mxu0 %v1320_v21  ;;  %2819 = vmatprep.subr.mxu1 %v1415_v22 }
 0x125   :  { %v6400_v30 = vpop.f32.mrf.mxu0  ;;  %v6402_v31 = vpop.f32.mrf.mxu1  ;;  %2737 = vmatpush1.msra.mxu0 %v1318_v19  ;;  %2820 = vmatpush1.msra.mxu1 %v1413_v20 }
 0x126   :  { %2738 = vmatprep.subr.mxu0 %v1314_v17  ;;  %2821 = vmatprep.subr.mxu1 %v1409_v18 }
 0x127   :  { %v1496_v32 = vpop.f32.mrf.mxu0  ;;  %v1591_v33 = vpop.f32.mrf.mxu1  ;;  %2739 = vmatpush1.msra.mxu0 %v1312_v15  ;;  %2822 = vmatpush1.msra.mxu1 %v1407_v16 }
 0x128   :  { %2740 = vmatprep.subr.mxu0 %v1308_v13  ;;  %2823 = vmatprep.subr.mxu1 %v1403_v14 }
 0x129   :  { %v1498_v35 = vpop.f32.mrf.mxu0  ;;  %v1593_v36 = vpop.f32.mrf.mxu1  ;;  %2741 = vmatpush1.msra.mxu0 %v1306_v11  ;;  %2824 = vmatpush1.msra.mxu1 %v1401_v12 }
 0x12a   :  { %2742 = vmatprep.subr.mxu0 %v6370_v9  ;;  %2825 = vmatprep.subr.mxu1 %v6372_v10 }
 0x12b   :  { %v1502_v37 = vpop.f32.mrf.mxu0  ;;  %v1597_v38 = vpop.f32.mrf.mxu1  ;;  %2743 = vmatpush1.msra.mxu0 %v6366_v6  ;;  %2826 = vmatpush1.msra.mxu1 %v6368_v8 }
 0x12c   :  { %4868 = vmatmul.mubr.msk.f32.vlgmr.msra.gmra.mxu0 %vm648_vm4, %v6287_v27  ;;  %4871 = vmatmul.mubr.msk.f32.vlgmr.msra.gmra.mxu1 %vm648_vm4, %v6287_v27 }
 0x12d   :  { %v1504_v39 = vpop.f32.mrf.mxu0  ;;  %v1599_v40 = vpop.f32.mrf.mxu1  ;;  %2782 = vmatprep.mubr.f32.mxu0 %v5032_v1  ;;  %2865 = vmatprep.mubr.f32.mxu1 %v5032_v1 }
 0x12f   :  { %v1508_v41 = vpop.f32.mrf.mxu0  ;;  %v1603_v43 = vpop.f32.mrf.mxu1 }
 0x130   :  { %4869 = vmatmul.mubr.msk.f32.gmra.mxu0 %vm648_vm4, %v6304_v34  ;;  %4872 = vmatmul.mubr.msk.f32.gmra.mxu1 %vm648_vm4, %v6304_v34 }
 0x131   :  { %v1510_v44 = vpop.f32.mrf.mxu0  ;;  %v1605_v45 = vpop.f32.mrf.mxu1  ;;  %2788 = vmatprep.mubr.f32.mxu0 %v5032_v1  ;;  %2871 = vmatprep.mubr.f32.mxu1 %v5032_v1 }
 0x133   :  { %v1514_v46 = vpop.f32.mrf.mxu0  ;;  %v1609_v47 = vpop.f32.mrf.mxu1 }
 0x134   :  { %4870 = vmatmul.mubr.msk.f32.gmra.mxu0 %vm648_vm4, %v6324_v42  ;;  %4873 = vmatmul.mubr.msk.f32.gmra.mxu1 %vm648_vm4, %v6324_v42 }
 0x135   :  { %v1516_v48 = vpop.f32.mrf.mxu0  ;;  %v1611_v49 = vpop.f32.mrf.mxu1  ;;  %2942 = vmatprep.mubr.f32.mxu0 %v5032_v1  ;;  %3025 = vmatprep.mubr.f32.mxu1 %v5032_v1 }
 0x136   :  { %2900 = vmatprep.subr.mxu0 %v1516_v48  ;;  %2983 = vmatprep.subr.mxu1 %v1611_v49 }
 0x137   :  { %v6426_v50 = vpop.f32.mrf.mxu0  ;;  %v6428_v51 = vpop.f32.mrf.mxu1  ;;  %2901 = vmatpush1.msra.mxu0 %v1514_v46  ;;  %2984 = vmatpush1.msra.mxu1 %v1609_v47 }
 0x138   :  { %2902 = vmatprep.subr.mxu0 %v1510_v44  ;;  %2985 = vmatprep.subr.mxu1 %v1605_v45 }
 0x139   :  { %v6430_v52 = vpop.f32.mrf.mxu0  ;;  %v6432_v53 = vpop.f32.mrf.mxu1  ;;  %2903 = vmatpush1.msra.mxu0 %v1508_v41  ;;  %2986 = vmatpush1.msra.mxu1 %v1603_v43 }
 0x13a   :  { %2904 = vmatprep.subr.mxu0 %v1504_v39  ;;  %2987 = vmatprep.subr.mxu1 %v1599_v40 }
 0x13b   :  { %v1686_v54 = vpop.f32.mrf.mxu0  ;;  %v1781_v55 = vpop.f32.mrf.mxu1  ;;  %2905 = vmatpush1.msra.mxu0 %v1502_v37  ;;  %2988 = vmatpush1.msra.mxu1 %v1597_v38 }
 0x13c   :  { %2906 = vmatprep.subr.mxu0 %v1498_v35  ;;  %2989 = vmatprep.subr.mxu1 %v1593_v36 }
 0x13d   :  { %v1688_v56 = vpop.f32.mrf.mxu0  ;;  %v1783_v57 = vpop.f32.mrf.mxu1  ;;  %2907 = vmatpush1.msra.mxu0 %v1496_v32  ;;  %2990 = vmatpush1.msra.mxu1 %v1591_v33 }
 0x13e   :  { %2908 = vmatprep.subr.mxu0 %v6400_v30  ;;  %2991 = vmatprep.subr.mxu1 %v6402_v31 }
 0x13f   :  { %v1692_v58 = vpop.f32.mrf.mxu0  ;;  %v1787_v59 = vpop.f32.mrf.mxu1  ;;  %2909 = vmatpush1.msra.mxu0 %v6396_v28  ;;  %2992 = vmatpush1.msra.mxu1 %v6398_v29 }
 0x140   :  { %4874 = vmatmul.mubr.msk.f32.vlgmr.msra.gmra.mxu0 %vm648_vm4, %v6287_v27  ;;  %4877 = vmatmul.mubr.msk.f32.vlgmr.msra.gmra.mxu1 %vm648_vm4, %v6287_v27 }
 0x141   :  { %v1694_v60 = vpop.f32.mrf.mxu0  ;;  %v1789_v61 = vpop.f32.mrf.mxu1  ;;  %2948 = vmatprep.mubr.f32.mxu0 %v5032_v1  ;;  %3031 = vmatprep.mubr.f32.mxu1 %v5032_v1 }
 0x143   :  { %v1698_v62 = vpop.f32.mrf.mxu0  ;;  %v1793_v63 = vpop.f32.mrf.mxu1 }
 0x144   :  { %4875 = vmatmul.mubr.msk.f32.gmra.mxu0 %vm648_vm4, %v6304_v34  ;;  %4878 = vmatmul.mubr.msk.f32.gmra.mxu1 %vm648_vm4, %v6304_v34 }
 0x145   :  { %v1700_v0 = vpop.f32.mrf.mxu0  ;;  %v1795_v3 = vpop.f32.mrf.mxu1  ;;  %2954 = vmatprep.mubr.f32.mxu0 %v5032_v1  ;;  %3037 = vmatprep.mubr.f32.mxu1 %v5032_v1 }
 0x147   :  { %v1704_v4 = vpop.f32.mrf.mxu0  ;;  %v1799_v5 = vpop.f32.mrf.mxu1 }
 0x148   :  { %4876 = vmatmul.mubr.msk.f32.gmra.mxu0 %vm648_vm4, %v6324_v42  ;;  %4879 = vmatmul.mubr.msk.f32.gmra.mxu1 %vm648_vm4, %v6324_v42 }
 0x149   :  { %v1706_v6 = vpop.f32.mrf.mxu0  ;;  %v1801_v8 = vpop.f32.mrf.mxu1  ;;  %3108 = vmatprep.mubr.f32.mxu0 %v5032_v1  ;;  %3191 = vmatprep.mubr.f32.mxu1 %v5032_v1 }
 0x14a   :  { %3066 = vmatprep.subr.mxu0 %v1706_v6  ;;  %3149 = vmatprep.subr.mxu1 %v1801_v8 }
 0x14b   :  { %v6456_v9 = vpop.f32.mrf.mxu0  ;;  %v6458_v10 = vpop.f32.mrf.mxu1  ;;  %3067 = vmatpush1.msra.mxu0 %v1704_v4  ;;  %3150 = vmatpush1.msra.mxu1 %v1799_v5 }
 0x14c   :  { %3068 = vmatprep.subr.mxu0 %v1700_v0  ;;  %3151 = vmatprep.subr.mxu1 %v1795_v3 }
 0x14d   :  { %v6460_v11 = vpop.f32.mrf.mxu0  ;;  %v6462_v12 = vpop.f32.mrf.mxu1  ;;  %3069 = vmatpush1.msra.mxu0 %v1698_v62  ;;  %3152 = vmatpush1.msra.mxu1 %v1793_v63 }
 0x14e   :  { %3070 = vmatprep.subr.mxu0 %v1694_v60  ;;  %3153 = vmatprep.subr.mxu1 %v1789_v61 }
 0x14f   :  { %v1876_v13 = vpop.f32.mrf.mxu0  ;;  %v1971_v14 = vpop.f32.mrf.mxu1  ;;  %3071 = vmatpush1.msra.mxu0 %v1692_v58  ;;  %3154 = vmatpush1.msra.mxu1 %v1787_v59 }
 0x150   :  { %3072 = vmatprep.subr.mxu0 %v1688_v56  ;;  %3155 = vmatprep.subr.mxu1 %v1783_v57 }
 0x151   :  { %v1878_v15 = vpop.f32.mrf.mxu0  ;;  %v1973_v16 = vpop.f32.mrf.mxu1  ;;  %3073 = vmatpush1.msra.mxu0 %v1686_v54  ;;  %3156 = vmatpush1.msra.mxu1 %v1781_v55 }
 0x152   :  { %3074 = vmatprep.subr.mxu0 %v6430_v52  ;;  %3157 = vmatprep.subr.mxu1 %v6432_v53  ;;  %v6532_v52 = vpop.permute.xlu1 %2202 }
 0x153   :  { %v1882_v17 = vpop.f32.mrf.mxu0  ;;  %v1977_v18 = vpop.f32.mrf.mxu1  ;;  %3075 = vmatpush1.msra.mxu0 %v6426_v50  ;;  %3158 = vmatpush1.msra.mxu1 %v6428_v51 }
 0x154   :  { %4880 = vmatmul.mubr.msk.f32.vlgmr.msra.gmra.mxu0 %vm648_vm4, %v6287_v27  ;;  %4883 = vmatmul.mubr.msk.f32.vlgmr.msra.gmra.mxu1 %vm648_vm4, %v6287_v27 }
 0x155   :  { %v1884_v19 = vpop.f32.mrf.mxu0  ;;  %v1979_v20 = vpop.f32.mrf.mxu1  ;;  %3114 = vmatprep.mubr.f32.mxu0 %v5032_v1  ;;  %3197 = vmatprep.mubr.f32.mxu1 %v5032_v1 }
 0x156   :  { %v6538_v58 = vpop.permute.xlu1 %3643 }
 0x157   :  { %v1888_v21 = vpop.f32.mrf.mxu0  ;;  %v1983_v22 = vpop.f32.mrf.mxu1 }
 0x158   :  { %4881 = vmatmul.mubr.msk.f32.gmra.mxu0 %vm648_vm4, %v6304_v34  ;;  %4884 = vmatmul.mubr.msk.f32.gmra.mxu1 %vm648_vm4, %v6304_v34 }
 0x159   :  { %v1890_v23 = vpop.f32.mrf.mxu0  ;;  %v1985_v24 = vpop.f32.mrf.mxu1  ;;  %3120 = vmatprep.mubr.f32.mxu0 %v5032_v1  ;;  %3203 = vmatprep.mubr.f32.mxu1 %v5032_v1 }
 0x15b   :  { %v1894_v25 = vpop.f32.mrf.mxu0  ;;  %v1989_v26 = vpop.f32.mrf.mxu1 }
 0x15c   :  { %4882 = vmatmul.mubr.msk.f32.gmra.mxu0 %vm648_vm4, %v6324_v42  ;;  %4885 = vmatmul.mubr.msk.f32.gmra.mxu1 %vm648_vm4, %v6324_v42 }
 0x15d   :  { %v1896_v28 = vpop.f32.mrf.mxu0  ;;  %v1991_v29 = vpop.f32.mrf.mxu1  ;;  %3274 = vmatprep.mubr.f32.mxu0 %v5032_v1  ;;  %3357 = vmatprep.mubr.f32.mxu1 %v5032_v1 }
 0x15e   :  { %3232 = vmatprep.subr.mxu0 %v1896_v28  ;;  %3315 = vmatprep.subr.mxu1 %v1991_v29 }
 0x15f   :  { %v6486_v30 = vpop.f32.mrf.mxu0  ;;  %v6488_v31 = vpop.f32.mrf.mxu1  ;;  %3233 = vmatpush1.msra.mxu0 %v1894_v25  ;;  %3316 = vmatpush1.msra.mxu1 %v1989_v26 }
 0x160   :  { %3234 = vmatprep.subr.mxu0 %v1890_v23  ;;  %3317 = vmatprep.subr.mxu1 %v1985_v24 }
 0x161   :  { %v2062_v32 = vpop.f32.mrf.mxu0  ;;  %v2157_v33 = vpop.f32.mrf.mxu1  ;;  %3235 = vmatpush1.msra.mxu0 %v1888_v21  ;;  %3318 = vmatpush1.msra.mxu1 %v1983_v22 }
 0x162   :  { %3236 = vmatprep.subr.mxu0 %v1884_v19  ;;  %3319 = vmatprep.subr.mxu1 %v1979_v20 }
 0x163   :  { %v2066_v35 = vpop.f32.mrf.mxu0  ;;  %v2161_v36 = vpop.f32.mrf.mxu1  ;;  %3237 = vmatpush1.msra.mxu0 %v1882_v17  ;;  %3320 = vmatpush1.msra.mxu1 %v1977_v18 }
 0x164   :  { %3238 = vmatprep.subr.mxu0 %v1878_v15  ;;  %3321 = vmatprep.subr.mxu1 %v1973_v16  ;;  %v6550_v18 = vpop.permute.xlu1 %3653 }
 0x165   :  { %v2068_v37 = vpop.f32.mrf.mxu0  ;;  %v2163_v38 = vpop.f32.mrf.mxu1  ;;  %3239 = vmatpush1.msra.mxu0 %v1876_v13  ;;  %3322 = vmatpush1.msra.mxu1 %v1971_v14 }
 0x166   :  { %3240 = vmatprep.subr.mxu0 %v6460_v11  ;;  %3323 = vmatprep.subr.mxu1 %v6462_v12 }
 0x167   :  { %v2072_v39 = vpop.f32.mrf.mxu0  ;;  %v2167_v40 = vpop.f32.mrf.mxu1  ;;  %3241 = vmatpush1.msra.mxu0 %v6456_v9  ;;  %3324 = vmatpush1.msra.mxu1 %v6458_v10 }
 0x168   :  { %4886 = vmatmul.mubr.msk.f32.vlgmr.msra.gmra.mxu0 %vm648_vm4, %v6287_v27  ;;  %4889 = vmatmul.mubr.msk.f32.vlgmr.msra.gmra.mxu1 %vm648_vm4, %v6287_v27 }
 0x169   :  { %v2074_v41 = vpop.f32.mrf.mxu0  ;;  %v2169_v43 = vpop.f32.mrf.mxu1  ;;  %3280 = vmatprep.mubr.f32.mxu0 %v5032_v1  ;;  %3363 = vmatprep.mubr.f32.mxu1 %v5032_v1 }
 0x16b   :  { %v2078_v44 = vpop.f32.mrf.mxu0  ;;  %v2173_v45 = vpop.f32.mrf.mxu1 }
 0x16c   :  { %4887 = vmatmul.mubr.msk.f32.gmra.mxu0 %vm648_vm4, %v6304_v34  ;;  %4890 = vmatmul.mubr.msk.f32.gmra.mxu1 %vm648_vm4, %v6304_v34 }
 0x16d   :  { %v2080_v46 = vpop.f32.mrf.mxu0  ;;  %v2175_v47 = vpop.f32.mrf.mxu1  ;;  %3286 = vmatprep.mubr.f32.mxu0 %v5032_v1  ;;  %3369 = vmatprep.mubr.f32.mxu1 %v5032_v1 }
 0x16f   :  { %v2084_v48 = vpop.f32.mrf.mxu0  ;;  %v2179_v49 = vpop.f32.mrf.mxu1 }
 0x170   :  { %4888 = vmatmul.mubr.msk.f32.gmra.mxu0 %vm648_vm4, %v6324_v42  ;;  %4891 = vmatmul.mubr.msk.f32.gmra.mxu1 %vm648_vm4, %v6324_v42 }
 0x171   :  { %v2086_v50 = vpop.f32.mrf.mxu0  ;;  %v2181_v51 = vpop.f32.mrf.mxu1  ;;  %3440 = vmatprep.mubr.f32.mxu0 %v5032_v1  ;;  %3523 = vmatprep.mubr.f32.mxu1 %v5032_v1 }
 0x172   :  { %3398 = vmatprep.subr.mxu0 %v2086_v50  ;;  %3481 = vmatprep.subr.mxu1 %v2181_v51 }
 0x173   :  { %3399 = vmatpush1.msra.mxu0 %v2084_v48  ;;  %3482 = vmatpush1.msra.mxu1 %v2179_v49 }
 0x174   :  { %3400 = vmatprep.subr.mxu0 %v2080_v46  ;;  %3483 = vmatprep.subr.mxu1 %v2175_v47 }
 0x175   :  { %3401 = vmatpush1.msra.mxu0 %v2078_v44  ;;  %3484 = vmatpush1.msra.mxu1 %v2173_v45  ;;  %v5035_v44 = vmov 1966171168  }
 0x176   :  { %3402 = vmatprep.subr.mxu0 %v2074_v41  ;;  %3485 = vmatprep.subr.mxu1 %v2169_v43  ;;  %v4247_v45 = vunpack.c.l.s4 %v5035_v44 }
 0x177   :  { %3403 = vmatpush1.msra.mxu0 %v2072_v39  ;;  %3486 = vmatpush1.msra.mxu1 %v2167_v40 }
 0x178   :  { %3404 = vmatprep.subr.mxu0 %v2068_v37  ;;  %3487 = vmatprep.subr.mxu1 %v2163_v38 }
 0x179   :  { %3405 = vmatpush1.msra.mxu0 %v2066_v35  ;;  %3488 = vmatpush1.msra.mxu1 %v2161_v36 }
 0x17a   :  { %3406 = vmatprep.subr.mxu0 %v2062_v32  ;;  %3489 = vmatprep.subr.mxu1 %v2157_v33 }
 0x17b   :  { %3407 = vmatpush1.msra.mxu0 %v6486_v30  ;;  %3490 = vmatpush1.msra.mxu1 %v6488_v31 }
 0x17c   :  { %4892 = vmatmul.mubr.msk.f32.vlgmr.msra.gmra.mxu0 %vm648_vm4, %v6287_v27  ;;  %4895 = vmatmul.mubr.msk.f32.vlgmr.msra.gmra.mxu1 %vm648_vm4, %v6287_v27  ;;  %v6530_v27 = vpop.permute.xlu0 %2192 }
 0x17d   :  { %3446 = vmatprep.mubr.f32.mxu0 %v5032_v1  ;;  %3529 = vmatprep.mubr.f32.mxu1 %v5032_v1 }
 0x180   :  { %4893 = vmatmul.mubr.msk.f32.gmra.mxu0 %vm648_vm4, %v6304_v34  ;;  %4896 = vmatmul.mubr.msk.f32.gmra.mxu1 %vm648_vm4, %v6304_v34  ;;  %v6534_v55 = vpop.permute.xlu0 %2197 }
 0x181   :  { %3452 = vmatprep.mubr.f32.mxu0 %v5032_v1  ;;  %3535 = vmatprep.mubr.f32.mxu1 %v5032_v1 }
 0x184   :  { %4894 = vmatmul.mubr.msk.f32.gmra.mxu0 %vm648_vm4, %v6324_v42  ;;  %4897 = vmatmul.mubr.msk.f32.gmra.mxu1 %vm648_vm4, %v6324_v42  ;;  %v6544_v9 = vpop.permute.xlu0 %3648 }
 0x1b0   :  { %v2280_v53 = vpop.f32.mrf.mxu0  ;;  %v2363_v54 = vpop.f32.mrf.mxu1 }
 0x1b1   :  { %v2281_v34 = vadd.f32 %v2280_v53, %v6530_v27  ;;  %v2364_v56 = vadd.f32 %v2363_v54, %v6530_v27 }
 0x1b2   :  { %v2282_v57 = vpop.f32.mrf.mxu0  ;;  %v2365_v1 = vpop.f32.mrf.mxu1 }
 0x1b3   :  { %v2283_v59 = vadd.f32 %v2282_v57, %v6530_v27  ;;  %v2366_v42 = vadd.f32 %v2365_v1, %v6530_v27  ;;  %v3542_v62 = vmax.f32 %v2281_v34, 0.0  ;;  %v3544_v63 = vmax.f32 %v2364_v56, 0.0  ;;  %v4012_v1 = vpop.permute.xlu0 %4011 }
 0x1b4   :  { %v2286_v60 = vpop.f32.mrf.mxu0  ;;  %v2369_v61 = vpop.f32.mrf.mxu1  ;;  %v4248_v57 = vunpack.c.0.s8 %v4247_v45 }
 0x1b5   :  { %v2287_v0 = vadd.f32 %v2286_v60, %v6534_v55  ;;  %v2370_v3 = vadd.f32 %v2369_v61, %v6534_v55  ;;  %v3543_v6 = vmax.f32 %v2283_v59, 0.0  ;;  %v3545_v8 = vmax.f32 %v2366_v42, 0.0 }
 0x1b6   :  { %v2288_v4 = vpop.f32.mrf.mxu0  ;;  %v2371_v5 = vpop.f32.mrf.mxu1  ;;  %v3656_v16 = vmul.f32 %v6538_v58, %v3542_v62  ;;  %v3658_v17 = vmul.f32 %v6538_v58, %v3544_v63 }
 0x1b7   :  { %v2289_v10 = vadd.f32 %v2288_v4, %v6534_v55  ;;  %v2372_v11 = vadd.f32 %v2371_v5, %v6534_v55  ;;  %v3574_v12 = vmax.f32 %v2287_v0, 0.0  ;;  %v3576_v13 = vmax.f32 %v2370_v3, 0.0 }
 0x1b8   :  { %v2292_v14 = vpop.f32.mrf.mxu0  ;;  %v2375_v15 = vpop.f32.mrf.mxu1  ;;  %v3657_v25 = vmul.f32 %v6538_v58, %v3543_v6  ;;  %v3659_v26 = vmul.f32 %v6538_v58, %v3545_v8 }
 0x1b9   :  { %v2293_v19 = vadd.f32 %v2292_v14, %v6532_v52  ;;  %v2376_v20 = vadd.f32 %v2375_v15, %v6532_v52  ;;  %v3575_v21 = vmax.f32 %v2289_v10, 0.0  ;;  %v3577_v22 = vmax.f32 %v2372_v11, 0.0 }
 0x1ba   :  { %v2294_v23 = vpop.f32.mrf.mxu0  ;;  %v2377_v24 = vpop.f32.mrf.mxu1  ;;  %v3688_v28 = vmul.f32 %v6544_v9, %v3574_v12  ;;  %v3690_v29 = vmul.f32 %v6544_v9, %v3576_v13  ;;  %v6569_v10 = vrot.slane %v4012_v1, %v5088_v7  ;;  %v6572_v11 = vsub.s32 %v4248_v57, %v5073_v2 }
 0x1bb   :  { %v2295_v30 = vadd.f32 %v2294_v23, %v6532_v52  ;;  %v2378_v31 = vadd.f32 %v2377_v24, %v6532_v52  ;;  %v3606_v32 = vmax.f32 %v2293_v19, 0.0  ;;  %v3608_v33 = vmax.f32 %v2376_v20, 0.0 }
 0x1bc   :  { %v3689_v35 = vmul.f32 %v6544_v9, %v3575_v21  ;;  %v3691_v36 = vmul.f32 %v6544_v9, %v3577_v22  ;;  %v3752_v37 = vadd.f32 %v3688_v28, %v3656_v16  ;;  %v3768_v38 = vadd.f32 %v3690_v29, %v3658_v17 }
 0x1bd   :  { %v3607_v39 = vmax.f32 %v2295_v30, 0.0  ;;  %v3609_v40 = vmax.f32 %v2378_v31, 0.0  ;;  %v3720_v41 = vmul.f32 %v6550_v18, %v3606_v32  ;;  %v3722_v43 = vmul.f32 %v6550_v18, %v3608_v33 }
 0x1be   :  { %v3760_v46 = vadd.f32 %v3689_v35, %v3657_v25  ;;  %v3776_v47 = vadd.f32 %v3691_v36, %v3659_v26 }
 0x1bf   :  { %v3721_v48 = vmul.f32 %v6550_v18, %v3607_v39  ;;  %v3723_v49 = vmul.f32 %v6550_v18, %v3609_v40  ;;  %v3753_v50 = vadd.f32 %v3752_v37, %v3720_v41  ;;  %v3769_v51 = vadd.f32 %v3768_v38, %v3722_v43 }
 0x1c1   :  { %v3754_v53 = vrot.slane %v3753_v50, 4  ;;  %v3761_v54 = vadd.f32 %v3760_v46, %v3721_v48  ;;  %v3770_v34 = vrot.slane %v3769_v51, 4  ;;  %v3777_v56 = vadd.f32 %v3776_v47, %v3723_v49 }
 0x1c3   :  { %v3755_v59 = vadd.f32 %v3754_v53, %v3753_v50  ;;  %v3762_v42 = vrot.slane %v3761_v54, 4  ;;  %v3771_v60 = vadd.f32 %v3770_v34, %v3769_v51  ;;  %v3778_v61 = vrot.slane %v3777_v56, 4 }
 0x1c4   :  { %v2446_v62 = vpop.f32.mrf.mxu0  ;;  %v2529_v63 = vpop.f32.mrf.mxu1 }
 0x1c5   :  { %v2447_v0 = vadd.f32 %v2446_v62, %v6530_v27  ;;  %v2530_v3 = vadd.f32 %v2529_v63, %v6530_v27  ;;  %v3756_v4 = vrot.slane %v3755_v59, 2  ;;  %v3763_v5 = vadd.f32 %v3762_v42, %v3761_v54 }
 0x1c6   :  { %v2448_v6 = vpop.f32.mrf.mxu0  ;;  %v2531_v8 = vpop.f32.mrf.mxu1  ;;  %v3772_v12 = vrot.slane %v3771_v60, 2  ;;  %v3779_v13 = vadd.f32 %v3778_v61, %v3777_v56 }
 0x1c7   :  { %v2449_v14 = vadd.f32 %v2448_v6, %v6530_v27  ;;  %v2532_v15 = vadd.f32 %v2531_v8, %v6530_v27  ;;  %v3546_v16 = vmax.f32 %v2447_v0, 0.0  ;;  %v3548_v17 = vmax.f32 %v2530_v3, 0.0 }
 0x1c8   :  { %v2452_v19 = vpop.f32.mrf.mxu0  ;;  %v2535_v20 = vpop.f32.mrf.mxu1  ;;  %v3757_v21 = vadd.f32 %v3756_v4, %v3755_v59  ;;  %v3764_v22 = vrot.slane %v3763_v5, 2  ;;  %v3773_v23 = vadd.f32 %v3772_v12, %v3771_v60  ;;  %v3780_v24 = vrot.slane %v3779_v13, 2 }
 0x1c9   :  { %v2453_v7 = vadd.f32 %v2452_v19, %v6534_v55  ;;  %v2536_v25 = vadd.f32 %v2535_v20, %v6534_v55  ;;  %v3547_v2 = vmax.f32 %v2449_v14, 0.0  ;;  %v3549_v26 = vmax.f32 %v2532_v15, 0.0 }
 0x1ca   :  { %v2454_v28 = vpop.f32.mrf.mxu0  ;;  %v2537_v29 = vpop.f32.mrf.mxu1  ;;  %v3660_v30 = vmul.f32 %v6538_v58, %v3546_v16  ;;  %v3662_v31 = vmul.f32 %v6538_v58, %v3548_v17  ;;  %v3758_v32 = vrot.slane %v3757_v21, 1  ;;  %v3765_v33 = vadd.f32 %v3764_v22, %v3763_v5 }
 0x1cb   :  { %v2455_v35 = vadd.f32 %v2454_v28, %v6534_v55  ;;  %v2538_v36 = vadd.f32 %v2537_v29, %v6534_v55  ;;  %v3578_v37 = vmax.f32 %v2453_v7, 0.0  ;;  %v3580_v38 = vmax.f32 %v2536_v25, 0.0 }
 0x1cc   :  { %v2458_v39 = vpop.f32.mrf.mxu0  ;;  %v2541_v40 = vpop.f32.mrf.mxu1  ;;  %v3661_v41 = vmul.f32 %v6538_v58, %v3547_v2  ;;  %v3663_v43 = vmul.f32 %v6538_v58, %v3549_v26  ;;  %v3759_v44 = vadd.f32 %v3758_v32, %v3757_v21  ;;  %v3766_v45 = vrot.slane %v3765_v33, 1 }
 0x1cd   :  { %v2459_v46 = vadd.f32 %v2458_v39, %v6532_v52  ;;  %v2542_v47 = vadd.f32 %v2541_v40, %v6532_v52  ;;  %v3579_v48 = vmax.f32 %v2455_v35, 0.0  ;;  %v3581_v49 = vmax.f32 %v2538_v36, 0.0 }
 0x1ce   :  { %v2460_v50 = vpop.f32.mrf.mxu0  ;;  %v2543_v51 = vpop.f32.mrf.mxu1  ;;  %v3692_v53 = vmul.f32 %v6544_v9, %v3578_v37  ;;  %v3694_v54 = vmul.f32 %v6544_v9, %v3580_v38  ;;  %v3767_v34 = vadd.f32 %v3766_v45, %v3765_v33  ;;  %v3774_v56 = vrot.slane %v3773_v23, 1 }
 0x1cf   :  { %v3610_v57 = vmax.f32 %v2459_v46, 0.0  ;;  %v3612_v1 = vmax.f32 %v2542_v47, 0.0  ;;  %v2461_v59 = vadd.f32 %v2460_v50, %v6532_v52  ;;  %v2544_v42 = vadd.f32 %v2543_v51, %v6532_v52 }
 0x1d0   :  { %v3693_v60 = vmul.f32 %v6544_v9, %v3579_v48  ;;  %v3695_v61 = vmul.f32 %v6544_v9, %v3581_v49  ;;  %v3775_v62 = vadd.f32 %v3774_v56, %v3773_v23  ;;  %v3781_v63 = vadd.f32 %v3780_v24, %v3779_v13 }
 0x1d1   :  { %v3611_v0 = vmax.f32 %v2461_v59, 0.0  ;;  %v3613_v3 = vmax.f32 %v2544_v42, 0.0  ;;  %v3724_v4 = vmul.f32 %v6550_v18, %v3610_v57  ;;  %v3726_v5 = vmul.f32 %v6550_v18, %v3612_v1 }
 0x1d2   :  { %v3782_v6 = vrot.slane %v3781_v63, 1  ;;  %v3784_v8 = vadd.f32 %v3692_v53, %v3660_v30  ;;  %v3792_v12 = vadd.f32 %v3693_v60, %v3661_v41  ;;  %v3800_v14 = vadd.f32 %v3694_v54, %v3662_v31 }
 0x1d3   :  { %v3725_v15 = vmul.f32 %v6550_v18, %v3611_v0  ;;  %v3727_v16 = vmul.f32 %v6550_v18, %v3613_v3  ;;  %v3808_v17 = vadd.f32 %v3695_v61, %v3663_v43  ;;  %v4018_v19 = vadd.f32 %v6569_v10, %v3759_v44 }
 0x1d4   :  { %v3783_v20 = vadd.f32 %v3782_v6, %v3781_v63  ;;  %v3785_v21 = vadd.f32 %v3784_v8, %v3724_v4  ;;  %v3801_v13 = vadd.f32 %v3800_v14, %v3726_v5  ;;  %v4019_v22 = vadd.f32 %v6569_v10, %v3767_v34 }
 0x1d5   :  { %v3793_v23 = vadd.f32 %v3792_v12, %v3725_v15  ;;  %v3809_v24 = vadd.f32 %v3808_v17, %v3727_v16  ;;  %v4020_v7 = vadd.f32 %v6569_v10, %v3775_v62  ;;  %v4050_v25 = vsub.f32 0.0, %v4018_v19 }
 0x1d6   :  { %v3786_v2 = vrot.slane %v3785_v21, 4  ;;  %v3802_v26 = vrot.slane %v3801_v13, 4  ;;  %v6600_v28 = vadd.f32 %v6569_v10, %v3783_v20  ;;  %v4051_v29 = vsub.f32 0.0, %v4019_v22 }
 0x1d7   :  { %v3794_v30 = vrot.slane %v3793_v23, 4  ;;  %v3810_v31 = vrot.slane %v3809_v24, 4  ;;  %v4052_v32 = vsub.f32 0.0, %v4020_v7  ;;  %v4082_v33 = vmul.f32 1.442695, %v4050_v25 }
 0x1d8   :  { %v2612_v35 = vpop.f32.mrf.mxu0  ;;  %v2695_v36 = vpop.f32.mrf.mxu1  ;;  %v3787_v37 = vadd.f32 %v3786_v2, %v3785_v21  ;;  %v3803_v38 = vadd.f32 %v3802_v26, %v3801_v13  ;;  %v4053_v39 = vsub.f32 0.0, %v6600_v28  ;;  %v6603_v40 = vmul.f32 1.442695, %v4051_v29 }
 0x1d9   :  { %v2613_v41 = vadd.f32 %v2612_v35, %v6530_v27  ;;  %v2696_v43 = vadd.f32 %v2695_v36, %v6530_v27  ;;  %v3795_v44 = vadd.f32 %v3794_v30, %v3793_v23  ;;  %v3811_v45 = vadd.f32 %v3810_v31, %v3809_v24 }
 0x1da   :  { %v2614_v46 = vpop.f32.mrf.mxu0  ;;  %v2697_v47 = vpop.f32.mrf.mxu1  ;;  %v3788_v48 = vrot.slane %v3787_v37, 2  ;;  %v3804_v49 = vrot.slane %v3803_v38, 2  ;;  %4904 = vpow2.f32 %v4082_v33  ;;  %v6607_v50 = vmul.f32 1.442695, %v4052_v32 }
 0x1db   :  { %v3550_v51 = vmax.f32 %v2613_v41, 0.0  ;;  %v3552_v53 = vmax.f32 %v2696_v43, 0.0  ;;  %v2615_v54 = vadd.f32 %v2614_v46, %v6530_v27  ;;  %v2698_v34 = vadd.f32 %v2697_v47, %v6530_v27 }
 0x1dc   :  { %v2618_v56 = vpop.f32.mrf.mxu0  ;;  %v2701_v57 = vpop.f32.mrf.mxu1  ;;  %v3789_v1 = vadd.f32 %v3788_v48, %v3787_v37  ;;  %v3796_v59 = vrot.slane %v3795_v44, 2  ;;  %v3805_v42 = vadd.f32 %v3804_v49, %v3803_v38  ;;  %v3812_v60 = vrot.slane %v3811_v45, 2 }
 0x1dd   :  { %v3664_v61 = vmul.f32 %v6538_v58, %v3550_v51  ;;  %v3666_v62 = vmul.f32 %v6538_v58, %v3552_v53  ;;  %v3551_v63 = vmax.f32 %v2615_v54, 0.0  ;;  %v3553_v0 = vmax.f32 %v2698_v34, 0.0 }
 0x1de   :  { %v2619_v3 = vadd.f32 %v2618_v56, %v6534_v55  ;;  %v2702_v4 = vadd.f32 %v2701_v57, %v6534_v55  ;;  %v2620_v5 = vpop.f32.mrf.mxu0  ;;  %v2703_v6 = vpop.f32.mrf.mxu1  ;;  %v3790_v8 = vrot.slane %v3789_v1, 1  ;;  %v3797_v12 = vadd.f32 %v3796_v59, %v3795_v44 }
 0x1df   :  { %v3665_v14 = vmul.f32 %v6538_v58, %v3551_v63  ;;  %v3667_v15 = vmul.f32 %v6538_v58, %v3553_v0  ;;  %v2621_v16 = vadd.f32 %v2620_v5, %v6534_v55  ;;  %v2704_v17 = vadd.f32 %v2703_v6, %v6534_v55 }
 0x1e0   :  { %v3582_v19 = vmax.f32 %v2619_v3, 0.0  ;;  %v3584_v20 = vmax.f32 %v2702_v4, 0.0  ;;  %v2624_v21 = vpop.f32.mrf.mxu0  ;;  %v2707_v13 = vpop.f32.mrf.mxu1  ;;  %v3791_v22 = vadd.f32 %v3790_v8, %v3789_v1  ;;  %v3798_v23 = vrot.slane %v3797_v12, 1 }
 0x1e1   :  { %v3583_v24 = vmax.f32 %v2621_v16, 0.0  ;;  %v3585_v7 = vmax.f32 %v2704_v17, 0.0  ;;  %v2625_v25 = vadd.f32 %v2624_v21, %v6532_v52  ;;  %v2708_v2 = vadd.f32 %v2707_v13, %v6532_v52 }
 0x1e2   :  { %v3696_v26 = vmul.f32 %v6544_v9, %v3582_v19  ;;  %v3698_v29 = vmul.f32 %v6544_v9, %v3584_v20  ;;  %v3799_v30 = vadd.f32 %v3798_v23, %v3797_v12  ;;  %v3806_v31 = vrot.slane %v3805_v42, 1  ;;  %v2626_v37 = vpop.f32.mrf.mxu0  ;;  %v2709_v38 = vpop.f32.mrf.mxu1 }
 0x1e3   :  { %v3697_v32 = vmul.f32 %v6544_v9, %v3583_v24  ;;  %v3699_v33 = vmul.f32 %v6544_v9, %v3585_v7  ;;  %v3614_v35 = vmax.f32 %v2625_v25, 0.0  ;;  %v3616_v36 = vmax.f32 %v2708_v2, 0.0 }
 0x1e4   :  { %v3816_v41 = vadd.f32 %v3696_v26, %v3664_v61  ;;  %v3832_v43 = vadd.f32 %v3698_v29, %v3666_v62  ;;  %v2627_v44 = vadd.f32 %v2626_v37, %v6532_v52  ;;  %v2710_v46 = vadd.f32 %v2709_v38, %v6532_v52 }
 0x1e5   :  { %v3824_v47 = vadd.f32 %v3697_v32, %v3665_v14  ;;  %v3840_v48 = vadd.f32 %v3699_v33, %v3667_v15  ;;  %v3728_v49 = vmul.f32 %v6550_v18, %v3614_v35  ;;  %v3730_v51 = vmul.f32 %v6550_v18, %v3616_v36 }
 0x1e6   :  { %v3615_v53 = vmax.f32 %v2627_v44, 0.0  ;;  %v3617_v54 = vmax.f32 %v2710_v46, 0.0  ;;  %v3807_v34 = vadd.f32 %v3806_v31, %v3805_v42  ;;  %v3813_v56 = vadd.f32 %v3812_v60, %v3811_v45 }
 0x1e7   :  { %v6629_v57 = vpop.eup %4904  ;;  %v3817_v1 = vadd.f32 %v3816_v41, %v3728_v49  ;;  %v3833_v59 = vadd.f32 %v3832_v43, %v3730_v51  ;;  %v6632_v61 = vadd.f32 %v6569_v10, %v3791_v22  ;;  %v6635_v62 = vadd.f32 %v6569_v10, %v3799_v30 }
 0x1e8   :  { %v3729_v63 = vmul.f32 %v6550_v18, %v3615_v53  ;;  %v3731_v0 = vmul.f32 %v6550_v18, %v3617_v54  ;;  %v3814_v3 = vrot.slane %v3813_v56, 1  ;;  %v6640_v4 = vadd.f32 %v6569_v10, %v3807_v34 }
 0x1e9   :  { %v3818_v42 = vrot.slane %v3817_v1, 4  ;;  %v3834_v45 = vrot.slane %v3833_v59, 4  ;;  %v4054_v60 = vsub.f32 0.0, %v6632_v61  ;;  %v4055_v5 = vsub.f32 0.0, %v6635_v62 }
 0x1ea   :  { %v3825_v6 = vadd.f32 %v3824_v47, %v3729_v63  ;;  %v3841_v8 = vadd.f32 %v3840_v48, %v3731_v0  ;;  %v3815_v12 = vadd.f32 %v3814_v3, %v3813_v56  ;;  %v4056_v14 = vsub.f32 0.0, %v6640_v4 }
 0x1eb   :  { %v3819_v15 = vadd.f32 %v3818_v42, %v3817_v1  ;;  %v3835_v16 = vadd.f32 %v3834_v45, %v3833_v59  ;;  %4906 = vpow2.f32 %v6603_v40  ;;  %v4088_v17 = vmul.f32 1.442695, %v4053_v39 }
 0x1ec   :  { %v3826_v19 = vrot.slane %v3825_v6, 4  ;;  %v3842_v20 = vrot.slane %v3841_v8, 4  ;;  %v2778_v21 = vpop.f32.mrf.mxu0  ;;  %v2861_v13 = vpop.f32.mrf.mxu1  ;;  %v6649_v22 = vadd.f32 %v6569_v10, %v3815_v12  ;;  %4908 = vpow2.f32 %v6607_v50 }
 0x1ed   :  { %v3820_v23 = vrot.slane %v3819_v15, 2  ;;  %v3836_v24 = vrot.slane %v3835_v16, 2  ;;  %v2779_v7 = vadd.f32 %v2778_v21, %v6530_v27  ;;  %v2862_v25 = vadd.f32 %v2861_v13, %v6530_v27 }
 0x1ee   :  { %v3827_v2 = vadd.f32 %v3826_v19, %v3825_v6  ;;  %v3843_v40 = vadd.f32 %v3842_v20, %v3841_v8  ;;  %v2780_v26 = vpop.f32.mrf.mxu0  ;;  %v2863_v28 = vpop.f32.mrf.mxu1  ;;  %v4057_v39 = vsub.f32 0.0, %v6649_v22  ;;  %4910 = vpow2.f32 %v4088_v17 }
 0x1ef   :  { %v3821_v29 = vadd.f32 %v3820_v23, %v3819_v15  ;;  %v3837_v30 = vadd.f32 %v3836_v24, %v3835_v16  ;;  %v3554_v31 = vmax.f32 %v2779_v7, 0.0  ;;  %v3556_v32 = vmax.f32 %v2862_v25, 0.0 }
 0x1f0   :  { %v3828_v33 = vrot.slane %v3827_v2, 2  ;;  %v3844_v35 = vrot.slane %v3843_v40, 2  ;;  %v2781_v50 = vadd.f32 %v2780_v26, %v6530_v27  ;;  %v2864_v36 = vadd.f32 %v2863_v28, %v6530_v27  ;;  %v2784_v37 = vpop.f32.mrf.mxu0  ;;  %v2867_v38 = vpop.f32.mrf.mxu1 }
 0x1f1   :  { %v3822_v41 = vrot.slane %v3821_v29, 1  ;;  %v3838_v43 = vrot.slane %v3837_v30, 1  ;;  %v3668_v44 = vmul.f32 %v6538_v58, %v3554_v31  ;;  %v3670_v46 = vmul.f32 %v6538_v58, %v3556_v32 }
 0x1f2   :  { %v3829_v47 = vadd.f32 %v3828_v33, %v3827_v2  ;;  %v3845_v48 = vadd.f32 %v3844_v35, %v3843_v40  ;;  %v3555_v49 = vmax.f32 %v2781_v50, 0.0  ;;  %v3557_v51 = vmax.f32 %v2864_v36, 0.0  ;;  %v2786_v53 = vpop.f32.mrf.mxu0  ;;  %v2869_v54 = vpop.f32.mrf.mxu1 }
 0x1f3   :  { %v3823_v34 = vadd.f32 %v3822_v41, %v3821_v29  ;;  %v3839_v56 = vadd.f32 %v3838_v43, %v3837_v30  ;;  %v2785_v1 = vadd.f32 %v2784_v37, %v6534_v55  ;;  %v2868_v59 = vadd.f32 %v2867_v38, %v6534_v55 }
 0x1f4   :  { %v3830_v63 = vrot.slane %v3829_v47, 1  ;;  %v3846_v0 = vrot.slane %v3845_v48, 1  ;;  %v3669_v3 = vmul.f32 %v6538_v58, %v3555_v49  ;;  %v3671_v42 = vmul.f32 %v6538_v58, %v3557_v51  ;;  %v2790_v45 = vpop.f32.mrf.mxu0  ;;  %v2873_v6 = vpop.f32.mrf.mxu1 }
 0x1f5   :  { %v3586_v8 = vmax.f32 %v2785_v1, 0.0  ;;  %v3588_v12 = vmax.f32 %v2868_v59, 0.0  ;;  %v2787_v15 = vadd.f32 %v2786_v53, %v6534_v55  ;;  %v2870_v16 = vadd.f32 %v2869_v54, %v6534_v55 }
 0x1f6   :  { %v3831_v17 = vadd.f32 %v3830_v63, %v3829_v47  ;;  %v3847_v19 = vadd.f32 %v3846_v0, %v3845_v48  ;;  %v2791_v20 = vadd.f32 %v2790_v45, %v6532_v52  ;;  %v2874_v21 = vadd.f32 %v2873_v6, %v6532_v52  ;;  %v2792_v13 = vpop.f32.mrf.mxu0  ;;  %v2875_v23 = vpop.f32.mrf.mxu1 }
 0x1f7   :  { %v3700_v24 = vmul.f32 %v6544_v9, %v3586_v8  ;;  %v3702_v7 = vmul.f32 %v6544_v9, %v3588_v12  ;;  %v3587_v25 = vmax.f32 %v2787_v15, 0.0  ;;  %v3589_v2 = vmax.f32 %v2870_v16, 0.0 }
 0x1f8   :  { %v4907_v40 = vpop.eup %4906  ;;  %v3618_v26 = vmax.f32 %v2791_v20, 0.0  ;;  %v3620_v28 = vmax.f32 %v2874_v21, 0.0  ;;  %v2793_v29 = vadd.f32 %v2792_v13, %v6532_v52  ;;  %v2876_v30 = vadd.f32 %v2875_v23, %v6532_v52 }
 0x1f9   :  { %v4909_v31 = vpop.eup %4908  ;;  %v3848_v32 = vadd.f32 %v3700_v24, %v3668_v44  ;;  %v3864_v33 = vadd.f32 %v3702_v7, %v3670_v46  ;;  %v3701_v35 = vmul.f32 %v6544_v9, %v3587_v25  ;;  %v3703_v50 = vmul.f32 %v6544_v9, %v3589_v2 }
 0x1fa   :  { %v3732_v36 = vmul.f32 %v6550_v18, %v3618_v26  ;;  %v3734_v37 = vmul.f32 %v6550_v18, %v3620_v28  ;;  %v3619_v38 = vmax.f32 %v2793_v29, 0.0  ;;  %v3621_v41 = vmax.f32 %v2876_v30, 0.0 }
 0x1fb   :  { %v4911_v43 = vpop.eup %4910  ;;  %v3856_v47 = vadd.f32 %v3701_v35, %v3669_v3  ;;  %v3872_v48 = vadd.f32 %v3703_v50, %v3671_v42  ;;  %v4026_v49 = vadd.f32 %v6569_v10, %v3823_v34  ;;  %v4027_v51 = vadd.f32 %v6569_v10, %v3831_v17 }
 0x1fc   :  { %v3849_v53 = vadd.f32 %v3848_v32, %v3732_v36  ;;  %v3865_v44 = vadd.f32 %v3864_v33, %v3734_v37  ;;  %v3733_v46 = vmul.f32 %v6550_v18, %v3619_v38  ;;  %v3735_v54 = vmul.f32 %v6550_v18, %v3621_v41 }
 0x1fd   :  { %v4028_v1 = vadd.f32 %v6569_v10, %v3839_v56  ;;  %v4029_v59 = vadd.f32 %v6569_v10, %v3847_v19  ;;  %v4058_v63 = vsub.f32 0.0, %v4026_v49  ;;  %v4059_v0 = vsub.f32 0.0, %v4027_v51 }
 0x1fe   :  { %v3850_v45 = vrot.slane %v3849_v53, 4  ;;  %v3866_v6 = vrot.slane %v3865_v44, 4  ;;  %v3857_v3 = vadd.f32 %v3856_v47, %v3733_v46  ;;  %v3873_v42 = vadd.f32 %v3872_v48, %v3735_v54 }
 0x1ff   :  { %v4060_v8 = vsub.f32 0.0, %v4028_v1  ;;  %v4061_v34 = vsub.f32 0.0, %v4029_v59  ;;  %v4090_v12 = vmul.f32 1.442695, %v4054_v60  ;;  %v4092_v15 = vmul.f32 1.442695, %v4055_v5 }
 0x200   :  { %v3851_v16 = vadd.f32 %v3850_v45, %v3849_v53  ;;  %v3867_v17 = vadd.f32 %v3866_v6, %v3865_v44  ;;  %v3858_v20 = vrot.slane %v3857_v3, 4  ;;  %v3874_v56 = vrot.slane %v3873_v42, 4  ;;  %v2944_v23 = vpop.f32.mrf.mxu0  ;;  %v3027_v30 = vpop.f32.mrf.mxu1 }
 0x201   :  { %4912 = vpow2.f32 %v4090_v12  ;;  %v4094_v19 = vmul.f32 1.442695, %v4056_v14  ;;  %v4096_v21 = vmul.f32 1.442695, %v4057_v39  ;;  %v4098_v13 = vmul.f32 1.442695, %v4058_v63 }
 0x202   :  { %v3852_v24 = vrot.slane %v3851_v16, 2  ;;  %v3868_v7 = vrot.slane %v3867_v17, 2  ;;  %v3859_v61 = vadd.f32 %v3858_v20, %v3857_v3  ;;  %v3875_v60 = vadd.f32 %v3874_v56, %v3873_v42  ;;  %v2946_v39 = vpop.f32.mrf.mxu0 }
 0x203   :  { %4914 = vpow2.f32 %v4092_v15  ;;  %v4100_v62 = vmul.f32 1.442695, %v4059_v0  ;;  %v4102_v5 = vmul.f32 1.442695, %v4060_v8  ;;  %v4104_v25 = vmul.f32 1.442695, %v4061_v34 }
 0x204   :  { %v3853_v2 = vadd.f32 %v3852_v24, %v3851_v16  ;;  %v3869_v26 = vadd.f32 %v3868_v7, %v3867_v17  ;;  %v3860_v28 = vrot.slane %v3859_v61, 2  ;;  %v3876_v29 = vrot.slane %v3875_v60, 2  ;;  %v2950_v53 = vpop.f32.mrf.mxu0 }
 0x205   :  { %4916 = vpow2.f32 %v4094_v19  ;;  %v6690_v4 = vadd.f32 1.0, %v6629_v57  ;;  %v6692_v14 = vadd.f32 1.0, %v4907_v40  ;;  %v6694_v22 = vadd.f32 1.0, %v4909_v31  ;;  %v3029_v40 = vpop.f32.mrf.mxu1 }
 0x206   :  { %v3854_v32 = vrot.slane %v3853_v2, 1  ;;  %v3870_v33 = vrot.slane %v3869_v26, 1  ;;  %v3861_v35 = vadd.f32 %v3860_v28, %v3859_v61  ;;  %v3877_v50 = vadd.f32 %v3876_v29, %v3875_v60  ;;  %v2952_v15 = vpop.f32.mrf.mxu0 }
 0x207   :  { %4918 = vpow2.f32 %v4096_v21  ;;  %v6696_v36 = vadd.f32 1.0, %v4911_v43  ;;  %v2945_v37 = vadd.f32 %v2944_v23, %v6530_v27  ;;  %v3028_v38 = vadd.f32 %v3027_v30, %v6530_v27  ;;  %v3033_v42 = vpop.f32.mrf.mxu1 }
 0x208   :  { %v3855_v41 = vadd.f32 %v3854_v32, %v3853_v2  ;;  %v3871_v47 = vadd.f32 %v3870_v33, %v3869_v26  ;;  %v3862_v57 = vrot.slane %v3861_v35, 1  ;;  %v3878_v48 = vrot.slane %v3877_v50, 1  ;;  %v2956_v28 = vpop.f32.mrf.mxu0 }
 0x209   :  { %4920 = vpow2.f32 %v4098_v13  ;;  %v3558_v31 = vmax.f32 %v2945_v37, 0.0  ;;  %v3560_v49 = vmax.f32 %v3028_v38, 0.0  ;;  %v2947_v51 = vadd.f32 %v2946_v39, %v6530_v27 }
 0x20a   :  { %v4030_v44 = vadd.f32 %v6569_v10, %v3855_v41  ;;  %v4032_v43 = vadd.f32 %v6569_v10, %v3871_v47  ;;  %v3863_v46 = vadd.f32 %v3862_v57, %v3861_v35  ;;  %v3879_v54 = vadd.f32 %v3878_v48, %v3877_v50 }
 0x20b   :  { %4922 = vpow2.f32 %v4100_v62  ;;  %v3672_v1 = vmul.f32 %v6538_v58, %v3558_v31  ;;  %v3674_v59 = vmul.f32 %v6538_v58, %v3560_v49  ;;  %v3559_v63 = vmax.f32 %v2947_v51, 0.0  ;;  %v3035_v62 = vpop.f32.mrf.mxu1  ;;  %v2958_v31 = vpop.f32.mrf.mxu0 }
 0x20c   :  { %v4062_v0 = vsub.f32 0.0, %v4030_v44  ;;  %v4064_v45 = vsub.f32 0.0, %v4032_v43  ;;  %v4031_v6 = vadd.f32 %v6569_v10, %v3863_v46  ;;  %v4033_v3 = vadd.f32 %v6569_v10, %v3879_v54 }
 0x20d   :  { %4924 = vpow2.f32 %v4102_v5  ;;  %v3673_v8 = vmul.f32 %v6538_v58, %v3559_v63  ;;  %v3030_v34 = vadd.f32 %v3029_v40, %v6530_v27  ;;  %v2951_v12 = vadd.f32 %v2950_v53, %v6534_v55  ;;  %v3039_v47 = vpop.f32.mrf.mxu1 }
 0x20e   :  { %v4913_v16 = vpop.eup %4912  ;;  %v4106_v17 = vmul.f32 1.442695, %v4062_v0  ;;  %v4110_v20 = vmul.f32 1.442695, %v4064_v45  ;;  %v4063_v56 = vsub.f32 0.0, %v4031_v6  ;;  %v4065_v19 = vsub.f32 0.0, %v4033_v3 }
 0x20f   :  { %4926 = vpow2.f32 %v4104_v25  ;;  %v4150_v21 = vadd.f32 1.0, %v4913_v16  ;;  %v3561_v13 = vmax.f32 %v3030_v34, 0.0  ;;  %v3590_v23 = vmax.f32 %v2951_v12, 0.0  ;;  %v3041_v45 = vpop.f32.mrf.mxu1 }
 0x210   :  { %v4915_v24 = vpop.eup %4914  ;;  %4928 = vpow2.f32 %v4106_v17  ;;  %v4108_v7 = vmul.f32 1.442695, %v4063_v56  ;;  %v4112_v61 = vmul.f32 1.442695, %v4065_v19  ;;  %v3034_v60 = vadd.f32 %v3033_v42, %v6534_v55 }
 0x211   :  { %4930 = vpow2.f32 %v4110_v20  ;;  %v4151_v5 = vadd.f32 1.0, %v4915_v24  ;;  %v3675_v2 = vmul.f32 %v6538_v58, %v3561_v13  ;;  %v3704_v26 = vmul.f32 %v6544_v9, %v3590_v23 }
 0x212   :  { %v4917_v29 = vpop.eup %4916  ;;  %4932 = vpow2.f32 %v4108_v7  ;;  %v3592_v25 = vmax.f32 %v3034_v60, 0.0  ;;  %v2953_v30 = vadd.f32 %v2952_v15, %v6534_v55  ;;  %v3036_v39 = vadd.f32 %v3035_v62, %v6534_v55 }
 0x213   :  { %4934 = vpow2.f32 %v4112_v61  ;;  %v4152_v32 = vadd.f32 1.0, %v4917_v29  ;;  %v3880_v33 = vadd.f32 %v3704_v26, %v3672_v1  ;;  %v2957_v35 = vadd.f32 %v2956_v28, %v6532_v52 }
 0x214   :  { %v4919_v50 = vpop.eup %4918  ;;  %4936 = vrcp.f32 %v6690_v4  ;;  %v3706_v37 = vmul.f32 %v6544_v9, %v3592_v25  ;;  %v3591_v38 = vmax.f32 %v2953_v30, 0.0  ;;  %v3593_v41 = vmax.f32 %v3036_v39, 0.0  ;;  %v3110_v6 = vpop.f32.mrf.mxu0 }
 0x215   :  { %v4153_v57 = vadd.f32 1.0, %v4919_v50  ;;  %4938 = vrcp.f32 %v6692_v14  ;;  %v3622_v48 = vmax.f32 %v2957_v35, 0.0  ;;  %v3040_v40 = vadd.f32 %v3039_v47, %v6532_v52  ;;  %v3193_v39 = vpop.f32.mrf.mxu1 }
 0x216   :  { %v4921_v49 = vpop.eup %4920  ;;  %4940 = vrcp.f32 %v6694_v22  ;;  %v3896_v51 = vadd.f32 %v3706_v37, %v3674_v59  ;;  %v3705_v53 = vmul.f32 %v6544_v9, %v3591_v38  ;;  %v3707_v4 = vmul.f32 %v6544_v9, %v3593_v41 }
 0x217   :  { %v4154_v44 = vadd.f32 1.0, %v4921_v49  ;;  %4942 = vrcp.f32 %v6696_v36  ;;  %v3736_v43 = vmul.f32 %v6550_v18, %v3622_v48  ;;  %v3624_v46 = vmax.f32 %v3040_v40, 0.0  ;;  %v3112_v49 = vpop.f32.mrf.mxu0 }
 0x218   :  { %v4923_v54 = vpop.eup %4922  ;;  %4944 = vrcp.f32 %v4150_v21  ;;  %v3888_v14 = vadd.f32 %v3705_v53, %v3673_v8  ;;  %v3904_v1 = vadd.f32 %v3707_v4, %v3675_v2  ;;  %v2959_v63 = vadd.f32 %v2958_v31, %v6532_v52 }
 0x219   :  { %v4155_v0 = vadd.f32 1.0, %v4923_v54  ;;  %4946 = vrcp.f32 %v4151_v5  ;;  %v3881_v22 = vadd.f32 %v3880_v33, %v3736_v43  ;;  %v3738_v59 = vmul.f32 %v6550_v18, %v3624_v46  ;;  %v3195_v46 = vpop.f32.mrf.mxu1 }
 0x21a   :  { %v4925_v3 = vpop.eup %4924  ;;  %4948 = vrcp.f32 %v4152_v32  ;;  %v3623_v42 = vmax.f32 %v2959_v63, 0.0  ;;  %v3042_v36 = vadd.f32 %v3041_v45, %v6532_v52  ;;  %v3111_v34 = vadd.f32 %v3110_v6, %v6530_v27 }
 0x21b   :  { %v4156_v12 = vadd.f32 1.0, %v4925_v3  ;;  %4950 = vrcp.f32 %v4153_v57  ;;  %v3882_v8 = vrot.slane %v3881_v22, 4  ;;  %v3897_v15 = vadd.f32 %v3896_v51, %v3738_v59 }
 0x21c   :  { %v4927_v16 = vpop.eup %4926  ;;  %4952 = vrcp.f32 %v4154_v44  ;;  %v3737_v17 = vmul.f32 %v6550_v18, %v3623_v42  ;;  %v3625_v20 = vmax.f32 %v3042_v36, 0.0  ;;  %v3562_v56 = vmax.f32 %v3111_v34, 0.0 }
 0x21d   :  { %v4929_v19 = vpop.eup %4928  ;;  %v4157_v21 = vadd.f32 1.0, %v4927_v16  ;;  %4954 = vrcp.f32 %v4155_v0  ;;  %v3883_v13 = vadd.f32 %v3882_v8, %v3881_v22  ;;  %v3898_v23 = vrot.slane %v3897_v15, 4 }
 0x21e   :  { %v4931_v24 = vpop.eup %4930  ;;  %v4158_v7 = vadd.f32 1.0, %v4929_v19  ;;  %4956 = vrcp.f32 %v4156_v12  ;;  %v3889_v61 = vadd.f32 %v3888_v14, %v3737_v17  ;;  %v3739_v60 = vmul.f32 %v6550_v18, %v3625_v20 }
 0x21f   :  { %v4933_v62 = vpop.eup %4932  ;;  %v4160_v5 = vadd.f32 1.0, %v4931_v24  ;;  %4958 = vrcp.f32 %v4157_v21  ;;  %v3884_v2 = vrot.slane %v3883_v13, 2  ;;  %v3899_v26 = vadd.f32 %v3898_v23, %v3897_v15  ;;  %v3116_v15 = vpop.f32.mrf.mxu0 }
 0x220   :  { %v4935_v28 = vpop.eup %4934  ;;  %4960 = vrcp.f32 %v4158_v7  ;;  %v4159_v29 = vadd.f32 1.0, %v4933_v62  ;;  %v3890_v25 = vrot.slane %v3889_v61, 4  ;;  %v3905_v30 = vadd.f32 %v3904_v1, %v3739_v60  ;;  %v3199_v21 = vpop.f32.mrf.mxu1 }
 0x221   :  { %v4937_v32 = vpop.eup %4936  ;;  %4962 = vrcp.f32 %v4160_v5  ;;  %v4161_v33 = vadd.f32 1.0, %v4935_v28  ;;  %v3885_v35 = vadd.f32 %v3884_v2, %v3883_v13  ;;  %v3900_v50 = vrot.slane %v3899_v26, 2 }
 0x222   :  { %v4939_v37 = vpop.eup %4938  ;;  %4964 = vrcp.f32 %v4159_v29  ;;  %v3891_v38 = vadd.f32 %v3890_v25, %v3889_v61  ;;  %v3906_v41 = vrot.slane %v3905_v30, 4  ;;  %v6732_v47 = vmul.f32 %v6538_v58, %v3562_v56 }
 0x223   :  { %v4941_v57 = vpop.eup %4940  ;;  %4966 = vrcp.f32 %v4161_v33  ;;  %v4242_v48 = vcombine.low %v4937_v32, %v4939_v37  ;;  %v3886_v40 = vrot.slane %v3885_v35, 1  ;;  %v3901_v31 = vadd.f32 %v3900_v50, %v3899_v26  ;;  %v3118_v32 = vpop.f32.mrf.mxu0 }
 0x224   :  { %v4943_v51 = vpop.eup %4942  ;;  %v3892_v53 = vrot.slane %v3891_v38, 2  ;;  %v3907_v4 = vadd.f32 %v3906_v41, %v3905_v30  ;;  %v3194_v44 = vadd.f32 %v3193_v39, %v6530_v27  ;;  %v3113_v43 = vadd.f32 %v3112_v49, %v6530_v27  ;;  %v3201_v41 = vpop.f32.mrf.mxu1 }
 0x225   :  { %v4945_v54 = vpop.eup %4944  ;;  %v4243_v14 = vcombine.low %v4941_v57, %v4943_v51  ;;  %v4252_v1 = vrot.slane %v4242_v48, %v6572_v11  ;;  %v3887_v63 = vadd.f32 %v3886_v40, %v3885_v35  ;;  %v3902_v0 = vrot.slane %v3901_v31, 1 }
 0x226   :  { %v4947_v22 = vpop.eup %4946  ;;  %v3893_v59 = vadd.f32 %v3892_v53, %v3891_v38  ;;  %v3908_v45 = vrot.slane %v3907_v4, 2  ;;  %v3564_v6 = vmax.f32 %v3194_v44, 0.0  ;;  %v3563_v3 = vmax.f32 %v3113_v43, 0.0 }
 0x227   :  { %v4949_v42 = vpop.eup %4948  ;;  %v4244_v36 = vcombine.low %v4945_v54, %v4947_v22  ;;  %v4259_v34 = vrot.slane %v4243_v14, %v6572_v11  ;;  %v4034_v12 = vadd.f32 %v6569_v10, %v3887_v63  ;;  %v3903_v8 = vadd.f32 %v3902_v0, %v3901_v31  ;;  %v3122_v63 = vpop.f32.mrf.mxu0 }
 0x228   :  { %v4951_v16 = vpop.eup %4950  ;;  %v3894_v17 = vrot.slane %v3893_v59, 1  ;;  %v3909_v20 = vadd.f32 %v3908_v45, %v3907_v4  ;;  %v6740_v56 = vmul.f32 %v6538_v58, %v3564_v6  ;;  %v6743_v19 = vmul.f32 %v6538_v58, %v3563_v3  ;;  %v3205_v6 = vpop.f32.mrf.mxu1 }
 0x229   :  { %v4953_v13 = vpop.eup %4952  ;;  %v4245_v23 = vcombine.low %v4949_v42, %v4951_v16  ;;  %v4266_v24 = vrot.slane %v4244_v36, %v6572_v11  ;;  %v4274_v7 = vcombine.low %v4252_v1, %v4259_v34  ;;  %v4066_v61 = vsub.f32 0.0, %v4034_v12 }
 0x22a   :  { %v4955_v60 = vpop.eup %4954  ;;  %v4036_v62 = vadd.f32 %v6569_v10, %v3903_v8  ;;  %v3895_v5 = vadd.f32 %v3894_v17, %v3893_v59  ;;  %v3910_v2 = vrot.slane %v3909_v20, 1  ;;  %v3196_v26 = vadd.f32 %v3195_v46, %v6530_v27 }
 0x22b   :  { %v4957_v28 = vpop.eup %4956  ;;  %v4273_v29 = vrot.slane %v4245_v23, %v6572_v11  ;;  %v4282_v25 = vrot.slane %v4274_v7, %v6572_v11  ;;  %v4291_v30 = vcombine.low %v4953_v13, %v4955_v60  ;;  %v4114_v39 = vmul.f32 1.442695, %v4066_v61  ;;  %v3124_v13 = vpop.f32.mrf.mxu0 }
 0x22c   :  { %v4959_v33 = vpop.eup %4958  ;;  %v4068_v35 = vsub.f32 0.0, %v4036_v62  ;;  %v4035_v50 = vadd.f32 %v6569_v10, %v3895_v5  ;;  %v3911_v37 = vadd.f32 %v3910_v2, %v3909_v20  ;;  %v3565_v38 = vmax.f32 %v3196_v26, 0.0  ;;  %v3207_v61 = vpop.f32.mrf.mxu1 }
 0x22d   :  { %v4961_v57 = vpop.eup %4960  ;;  %v4275_v48 = vcombine.low %v4266_v24, %v4273_v29  ;;  %v4292_v40 = vcombine.low %v4957_v28, %v4959_v33  ;;  %v4301_v31 = vrot.slane %v4291_v30, %v6572_v11  ;;  %4968 = vpow2.f32 %v4114_v39  ;;  %v3276_v30 = vpop.f32.mrf.mxu0 }
 0x22e   :  { %v4963_v49 = vpop.eup %4962  ;;  %v4118_v51 = vmul.f32 1.442695, %v4068_v35  ;;  %v4067_v53 = vsub.f32 0.0, %v4035_v50  ;;  %v4037_v4 = vadd.f32 %v6569_v10, %v3911_v37  ;;  %v3679_v44 = vmul.f32 %v6538_v58, %v3565_v38  ;;  %v3359_v50 = vpop.f32.mrf.mxu1 }
 0x22f   :  { %v4965_v43 = vpop.eup %4964  ;;  %v4289_v46 = vrot.slane %v4275_v48, %v6572_v11  ;;  %v4308_v54 = vrot.slane %v4292_v40, %v6572_v11  ;;  %v3117_v14 = vadd.f32 %v3116_v15, %v6534_v55  ;;  %v3200_v1 = vadd.f32 %v3199_v21, %v6534_v55 }
 0x230   :  { %v4967_v0 = vpop.eup %4966  ;;  %v4293_v22 = vcombine.low %v4961_v57, %v4965_v43  ;;  %4970 = vpow2.f32 %v4118_v51  ;;  %v4116_v59 = vmul.f32 1.442695, %v4067_v53  ;;  %v4069_v45 = vsub.f32 0.0, %v4037_v4  ;;  %v3278_v43 = vpop.f32.mrf.mxu0 }
 0x231   :  { %v4290_v3 = vcombine.low %v4282_v25, %v4289_v46  ;;  %v4294_v42 = vcombine.low %v4963_v49, %v4967_v0  ;;  %v4323_v36 = vcombine.low %v4301_v31, %v4308_v54  ;;  %v3594_v34 = vmax.f32 %v3117_v14, 0.0 }
 0x232   :  { %v4315_v12 = vrot.slane %v4293_v22, %v6572_v11  ;;  %4972 = vpow2.f32 %v4116_v59  ;;  %v4120_v8 = vmul.f32 1.442695, %v4069_v45  ;;  %v3596_v16 = vmax.f32 %v3200_v1, 0.0  ;;  %v3361_v1 = vpop.f32.mrf.mxu1 }
 0x233   :  { %v4322_v15 = vrot.slane %v4294_v42, %v6572_v11  ;;  %v4331_v17 = vrot.slane %v4323_v36, %v6572_v11  ;;  %4442 = vst [vmem:[%s6878_s6] sm:$0xff] %v4290_v3  ;;  %v3708_v20 = vmul.f32 %v6544_v9, %v3594_v34  ;;  %v3119_v21 = vadd.f32 %v3118_v32, %v6534_v55 }
 0x234   :  { %4974 = vpow2.f32 %v4120_v8  ;;  %v3710_v23 = vmul.f32 %v6544_v9, %v3596_v16  ;;  %v3202_v24 = vadd.f32 %v3201_v41, %v6534_v55  ;;  %v3123_v7 = vadd.f32 %v3122_v63, %v6532_v52  ;;  %v3282_v8 = vpop.f32.mrf.mxu0 }
 0x235   :  { %v4324_v60 = vcombine.low %v4315_v12, %v4322_v15  ;;  %v3912_v62 = vadd.f32 %v3708_v20, %v6732_v47  ;;  %v3595_v5 = vmax.f32 %v3119_v21, 0.0  ;;  %v3206_v2 = vadd.f32 %v3205_v6, %v6532_v52  ;;  %v3365_v21 = vpop.f32.mrf.mxu1 }
 0x236   :  { %v3928_v26 = vadd.f32 %v3710_v23, %v6740_v56  ;;  %v3597_v28 = vmax.f32 %v3202_v24, 0.0  ;;  %v3626_v29 = vmax.f32 %v3123_v7, 0.0  ;;  %v3125_v25 = vadd.f32 %v3124_v13, %v6532_v52 }
 0x237   :  { %v4338_v39 = vrot.slane %v4324_v60, %v6572_v11  ;;  %v3709_v32 = vmul.f32 %v6544_v9, %v3595_v5  ;;  %v3628_v33 = vmax.f32 %v3206_v2, 0.0  ;;  %v3208_v35 = vadd.f32 %v3207_v61, %v6532_v52 }
 0x238   :  { %v3711_v47 = vmul.f32 %v6544_v9, %v3597_v28  ;;  %v3740_v37 = vmul.f32 %v6550_v18, %v3626_v29  ;;  %v3627_v38 = vmax.f32 %v3125_v25, 0.0  ;;  %v3277_v56 = vadd.f32 %v3276_v30, %v6530_v27  ;;  %v3284_v29 = vpop.f32.mrf.mxu0 }
 0x239   :  { %v4339_v41 = vcombine.low %v4331_v17, %v4338_v39  ;;  %v3920_v57 = vadd.f32 %v3709_v32, %v6743_v19  ;;  %v3742_v48 = vmul.f32 %v6550_v18, %v3628_v33  ;;  %v3629_v40 = vmax.f32 %v3208_v35, 0.0  ;;  %v3367_v33 = vpop.f32.mrf.mxu1 }
 0x23a   :  { %v4969_v31 = vpop.eup %4968  ;;  %v3936_v49 = vadd.f32 %v3711_v47, %v3679_v44  ;;  %v3913_v51 = vadd.f32 %v3912_v62, %v3740_v37  ;;  %v3741_v53 = vmul.f32 %v6550_v18, %v3627_v38  ;;  %v3566_v4 = vmax.f32 %v3277_v56, 0.0 }
 0x23b   :  { %4443 = vst [vmem:[%s6878_s6 + $0x8] sm:$0xff] %v4339_v41  ;;  %v4162_v46 = vadd.f32 1.0, %v4969_v31  ;;  %v3929_v54 = vadd.f32 %v3928_v26, %v3742_v48  ;;  %v3743_v14 = vmul.f32 %v6550_v18, %v3629_v40  ;;  %v3360_v19 = vadd.f32 %v3359_v50, %v6530_v27 }
 0x23c   :  { %v3914_v63 = vrot.slane %v3913_v51, 4  ;;  %v3921_v0 = vadd.f32 %v3920_v57, %v3741_v53  ;;  %v3279_v44 = vadd.f32 %v3278_v43, %v6530_v27  ;;  %v3680_v6 = vmul.f32 %v6538_v58, %v3566_v4 }
 0x23d   :  { %v4971_v22 = vpop.eup %4970  ;;  %v3930_v59 = vrot.slane %v3929_v54, 4  ;;  %v3937_v45 = vadd.f32 %v3936_v49, %v3743_v14  ;;  %v3568_v3 = vmax.f32 %v3360_v19, 0.0  ;;  %4976 = vrcp.f32 %v4162_v46 }
 0x23e   :  { %v4164_v42 = vadd.f32 1.0, %v4971_v22  ;;  %v3915_v36 = vadd.f32 %v3914_v63, %v3913_v51  ;;  %v3922_v34 = vrot.slane %v3921_v0, 4  ;;  %v3567_v12 = vmax.f32 %v3279_v44, 0.0  ;;  %v3288_v51 = vpop.f32.mrf.mxu0 }
 0x23f   :  { %v4973_v16 = vpop.eup %4972  ;;  %v3931_v15 = vadd.f32 %v3930_v59, %v3929_v54  ;;  %v3938_v17 = vrot.slane %v3937_v45, 4  ;;  %v3362_v20 = vadd.f32 %v3361_v1, %v6530_v27  ;;  %v3682_v7 = vmul.f32 %v6538_v58, %v3568_v3  ;;  %v3371_v54 = vpop.f32.mrf.mxu1 }
 0x240   :  { %v4163_v13 = vadd.f32 1.0, %v4973_v16  ;;  %v3916_v23 = vrot.slane %v3915_v36, 2  ;;  %v3923_v24 = vadd.f32 %v3922_v34, %v3921_v0  ;;  %4978 = vrcp.f32 %v4164_v42 }
 0x241   :  { %v4975_v61 = vpop.eup %4974  ;;  %v3932_v60 = vrot.slane %v3931_v15, 2  ;;  %v3939_v62 = vadd.f32 %v3938_v17, %v3937_v45  ;;  %v3569_v5 = vmax.f32 %v3362_v20, 0.0  ;;  %v3681_v28 = vmul.f32 %v6538_v58, %v3567_v12 }
 0x242   :  { %4980 = vrcp.f32 %v4163_v13  ;;  %v3917_v2 = vadd.f32 %v3916_v23, %v3915_v36  ;;  %v3924_v26 = vrot.slane %v3923_v24, 2  ;;  %v4165_v25 = vadd.f32 1.0, %v4975_v61  ;;  %v3290_v36 = vpop.f32.mrf.mxu0 }
 0x243   :  { %v3933_v30 = vadd.f32 %v3932_v60, %v3931_v15  ;;  %v3940_v39 = vrot.slane %v3939_v62, 2  ;;  %v3283_v32 = vadd.f32 %v3282_v8, %v6534_v55  ;;  %v3683_v47 = vmul.f32 %v6538_v58, %v3569_v5  ;;  %v3373_v15 = vpop.f32.mrf.mxu1 }
 0x244   :  { %v3918_v35 = vrot.slane %v3917_v2, 1  ;;  %v3925_v50 = vadd.f32 %v3924_v26, %v3923_v24  ;;  %v3366_v37 = vadd.f32 %v3365_v21, %v6534_v55  ;;  %v3285_v57 = vadd.f32 %v3284_v29, %v6534_v55 }
 0x245   :  { %v3934_v38 = vrot.slane %v3933_v30, 1  ;;  %v3941_v56 = vadd.f32 %v3940_v39, %v3939_v62  ;;  %v3598_v41 = vmax.f32 %v3283_v32, 0.0  ;;  %v3368_v49 = vadd.f32 %v3367_v33, %v6534_v55 }
 0x246   :  { %v3919_v48 = vadd.f32 %v3918_v35, %v3917_v2  ;;  %v3926_v40 = vrot.slane %v3925_v50, 1  ;;  %v3600_v31 = vmax.f32 %v3366_v37, 0.0  ;;  %v3599_v46 = vmax.f32 %v3285_v57, 0.0  ;;  %v3525_v37 = vpop.f32.mrf.mxu1 }
 0x247   :  { %v3935_v53 = vadd.f32 %v3934_v38, %v3933_v30  ;;  %v3942_v4 = vrot.slane %v3941_v56, 1  ;;  %v3712_v43 = vmul.f32 %v6544_v9, %v3598_v41  ;;  %v3601_v63 = vmax.f32 %v3368_v49, 0.0  ;;  %v3442_v30 = vpop.f32.mrf.mxu0 }
 0x248   :  { %v4038_v14 = vadd.f32 %v6569_v10, %v3919_v48  ;;  %v3927_v19 = vadd.f32 %v3926_v40, %v3925_v50  ;;  %v3714_v1 = vmul.f32 %v6544_v9, %v3600_v31  ;;  %4982 = vrcp.f32 %v4165_v25 }
 0x249   :  { %v4040_v0 = vadd.f32 %v6569_v10, %v3935_v53  ;;  %v3943_v44 = vadd.f32 %v3942_v4, %v3941_v56  ;;  %v3713_v22 = vmul.f32 %v6544_v9, %v3599_v46  ;;  %v3944_v3 = vadd.f32 %v3712_v43, %v3680_v6  ;;  %v3444_v57 = vpop.f32.mrf.mxu0 }
 0x24a   :  { %v4070_v59 = vsub.f32 0.0, %v4038_v14  ;;  %v4039_v45 = vadd.f32 %v6569_v10, %v3927_v19  ;;  %v3960_v42 = vadd.f32 %v3714_v1, %v3682_v7  ;;  %v3715_v8 = vmul.f32 %v6544_v9, %v3601_v63  ;;  %v4977_v17 = vpop.eup %4976 }
 0x24b   :  { %v4072_v34 = vsub.f32 0.0, %v4040_v0  ;;  %v4041_v12 = vadd.f32 %v6569_v10, %v3943_v44  ;;  %v3289_v16 = vadd.f32 %v3288_v51, %v6532_v52  ;;  %v3952_v13 = vadd.f32 %v3713_v22, %v3681_v28  ;;  %v3527_v51 = vpop.f32.mrf.mxu1  ;;  %v3448_v46 = vpop.f32.mrf.mxu0 }
 0x24c   :  { %v4122_v20 = vmul.f32 1.442695, %v4070_v59  ;;  %v4071_v21 = vsub.f32 0.0, %v4039_v45  ;;  %v3372_v23 = vadd.f32 %v3371_v54, %v6532_v52  ;;  %v3291_v6 = vadd.f32 %v3290_v36, %v6532_v52 }
 0x24d   :  { %v4126_v24 = vmul.f32 1.442695, %v4072_v34  ;;  %v4073_v61 = vsub.f32 0.0, %v4041_v12  ;;  %v3630_v60 = vmax.f32 %v3289_v16, 0.0  ;;  %v6808_v7 = vpop.eup %4978  ;;  %v3374_v2 = vadd.f32 %v3373_v15, %v6532_v52  ;;  %v3531_v63 = vpop.f32.mrf.mxu1 }
 0x24e   :  { %4984 = vpow2.f32 %v4122_v20  ;;  %v4124_v62 = vmul.f32 1.442695, %v4071_v21  ;;  %v3632_v5 = vmax.f32 %v3372_v23, 0.0  ;;  %v3631_v28 = vmax.f32 %v3291_v6, 0.0  ;;  %v3450_v16 = vpop.f32.mrf.mxu0 }
 0x24f   :  { %v4981_v26 = vpop.eup %4980  ;;  %4986 = vpow2.f32 %v4126_v24  ;;  %v4128_v29 = vmul.f32 1.442695, %v4073_v61  ;;  %v3744_v25 = vmul.f32 %v6550_v18, %v3630_v60  ;;  %v3968_v39 = vadd.f32 %v3715_v8, %v3683_v47  ;;  %v3533_v23 = vpop.f32.mrf.mxu1 }
 0x250   :  { %4988 = vpow2.f32 %v4124_v62  ;;  %v3746_v32 = vmul.f32 %v6550_v18, %v3632_v5  ;;  %v3633_v33 = vmax.f32 %v3374_v2, 0.0  ;;  %v3745_v50 = vmul.f32 %v6550_v18, %v3631_v28 }
 0x251   :  { %4990 = vpow2.f32 %v4128_v29  ;;  %v3945_v35 = vadd.f32 %v3944_v3, %v3744_v25  ;;  %v4340_v4 = vcombine.low %v4977_v17, %v4981_v26  ;;  %v3449_v44 = vadd.f32 %v3448_v46, %v6534_v55  ;;  %v3454_v25 = vpop.f32.mrf.mxu0 }
 0x252   :  { %v3961_v38 = vadd.f32 %v3960_v42, %v3746_v32  ;;  %v3747_v56 = vmul.f32 %v6550_v18, %v3633_v33  ;;  %v3953_v41 = vadd.f32 %v3952_v13, %v3745_v50  ;;  %v3443_v3 = vadd.f32 %v3442_v30, %v6530_v27  ;;  %v3537_v32 = vpop.f32.mrf.mxu1 }
 0x253   :  { %v3946_v48 = vrot.slane %v3945_v35, 4  ;;  %v6817_v59 = vrot.slane %v4340_v4, %v6572_v11  ;;  %v3526_v8 = vadd.f32 %v3525_v37, %v6530_v27  ;;  %v3445_v21 = vadd.f32 %v3444_v57, %v6530_v27 }
 0x254   :  { %v3962_v40 = vrot.slane %v3961_v38, 4  ;;  %v3969_v31 = vadd.f32 %v3968_v39, %v3747_v56  ;;  %v3954_v49 = vrot.slane %v3953_v41, 4  ;;  %v3532_v13 = vadd.f32 %v3531_v63, %v6534_v55  ;;  %v3539_v4 = vpop.f32.mrf.mxu1 }
 0x255   :  { %v4983_v53 = vpop.eup %4982  ;;  %v3947_v54 = vadd.f32 %v3946_v48, %v3945_v35  ;;  %v3602_v6 = vmax.f32 %v3449_v44, 0.0  ;;  %v3570_v62 = vmax.f32 %v3443_v3, 0.0  ;;  %v3451_v5 = vadd.f32 %v3450_v16, %v6534_v55 }
 0x256   :  { %v3970_v47 = vrot.slane %v3969_v31, 4  ;;  %v3955_v43 = vadd.f32 %v3954_v49, %v3953_v41  ;;  %v3963_v14 = vadd.f32 %v3962_v40, %v3961_v38  ;;  %v4341_v45 = vcombine.low %v6808_v7, %v4983_v53  ;;  %v3456_v49 = vpop.f32.mrf.mxu0 }
 0x257   :  { %v3948_v34 = vrot.slane %v3947_v54, 2  ;;  %v3572_v29 = vmax.f32 %v3526_v8, 0.0  ;;  %v3571_v28 = vmax.f32 %v3445_v21, 0.0  ;;  %v3528_v30 = vadd.f32 %v3527_v51, %v6530_v27 }
 0x258   :  { %v3971_v19 = vadd.f32 %v3970_v47, %v3969_v31  ;;  %v3956_v1 = vrot.slane %v3955_v43, 2  ;;  %v3964_v12 = vrot.slane %v3963_v14, 2  ;;  %v3604_v39 = vmax.f32 %v3532_v13, 0.0 }
 0x259   :  { %v3949_v2 = vadd.f32 %v3948_v34, %v3947_v54  ;;  %v3716_v50 = vmul.f32 %v6544_v9, %v3602_v6  ;;  %v3534_v37 = vadd.f32 %v3533_v23, %v6534_v55  ;;  %v6829_v38 = vrot.slane %v4341_v45, %v6572_v11 }
 0x25a   :  { %v3972_v0 = vrot.slane %v3971_v19, 2  ;;  %v3957_v20 = vadd.f32 %v3956_v1, %v3955_v43  ;;  %v3965_v26 = vadd.f32 %v3964_v12, %v3963_v14  ;;  %v3684_v56 = vmul.f32 %v6538_v58, %v3570_v62 }
 0x25b   :  { %v4985_v22 = vpop.eup %4984  ;;  %v3603_v41 = vmax.f32 %v3451_v5, 0.0  ;;  %v3455_v57 = vadd.f32 %v3454_v25, %v6532_v52  ;;  %v3950_v48 = vrot.slane %v3949_v2, 1  ;;  %v3686_v27 = vmul.f32 %v6538_v58, %v3572_v29 }
 0x25c   :  { %v4987_v42 = vpop.eup %4986  ;;  %v4166_v36 = vadd.f32 1.0, %v4985_v22  ;;  %v3973_v60 = vadd.f32 %v3972_v0, %v3971_v19  ;;  %v3958_v33 = vrot.slane %v3957_v20, 1  ;;  %v3966_v40 = vrot.slane %v3965_v26, 1 }
 0x25d   :  { %v4989_v15 = vpop.eup %4988  ;;  %v4168_v17 = vadd.f32 1.0, %v4987_v42  ;;  %v3605_v31 = vmax.f32 %v3534_v37, 0.0  ;;  %v3685_v51 = vmul.f32 %v6538_v58, %v3571_v28  ;;  %v3718_v53 = vmul.f32 %v6544_v9, %v3604_v39 }
 0x25e   :  { %v4991_v24 = vpop.eup %4990  ;;  %4992 = vrcp.f32 %v4166_v36  ;;  %v4167_v61 = vadd.f32 1.0, %v4989_v15  ;;  %v3974_v35 = vrot.slane %v3973_v60, 1  ;;  %v3634_v47 = vmax.f32 %v3455_v57, 0.0 }
 0x25f   :  { %4994 = vrcp.f32 %v4168_v17  ;;  %v4169_v7 = vadd.f32 1.0, %v4991_v24  ;;  %v3538_v55 = vadd.f32 %v3537_v32, %v6532_v52  ;;  %v3959_v43 = vadd.f32 %v3958_v33, %v3957_v20 }
 0x260   :  { %4996 = vrcp.f32 %v4167_v61  ;;  %v3975_v46 = vadd.f32 %v3974_v35, %v3973_v60  ;;  %v3573_v54 = vmax.f32 %v3528_v30, 0.0  ;;  %v3976_v14 = vadd.f32 %v3716_v50, %v3684_v56 }
 0x261   :  { %4998 = vrcp.f32 %v4169_v7  ;;  %v3717_v19 = vmul.f32 %v6544_v9, %v3603_v41  ;;  %v3748_v1 = vmul.f32 %v6550_v18, %v3634_v47  ;;  %v3636_v63 = vmax.f32 %v3538_v55, 0.0 }
 0x262   :  { %v3457_v0 = vadd.f32 %v3456_v49, %v6532_v52  ;;  %v3951_v44 = vadd.f32 %v3950_v48, %v3949_v2  ;;  %v3967_v22 = vadd.f32 %v3966_v40, %v3965_v26  ;;  %v3719_v45 = vmul.f32 %v6544_v9, %v3605_v31 }
 0x263   :  { %v3540_v3 = vadd.f32 %v3539_v4, %v6532_v52  ;;  %v3992_v42 = vadd.f32 %v3718_v53, %v3686_v27  ;;  %v3977_v36 = vadd.f32 %v3976_v14, %v3748_v1  ;;  %v3750_v34 = vmul.f32 %v6550_v18, %v3636_v63 }
 0x264   :  { %v3635_v12 = vmax.f32 %v3457_v0, 0.0  ;;  %v4043_v8 = vadd.f32 %v6569_v10, %v3959_v43  ;;  %v4045_v16 = vadd.f32 %v6569_v10, %v3975_v46  ;;  %v3687_v15 = vmul.f32 %v6538_v58, %v3573_v54 }
 0x265   :  { %v3637_v17 = vmax.f32 %v3540_v3, 0.0  ;;  %v3984_v21 = vadd.f32 %v3717_v19, %v3685_v51  ;;  %v3978_v13 = vrot.slane %v3977_v36, 4  ;;  %v3993_v23 = vadd.f32 %v3992_v42, %v3750_v34 }
 0x266   :  { %v3749_v9 = vmul.f32 %v6550_v18, %v3635_v12  ;;  %v4042_v52 = vadd.f32 %v6569_v10, %v3951_v44  ;;  %v4044_v61 = vadd.f32 %v6569_v10, %v3967_v22  ;;  %v4000_v60 = vadd.f32 %v3719_v45, %v3687_v15 }
 0x267   :  { %v3751_v6 = vmul.f32 %v6550_v18, %v3637_v17  ;;  %v4372_v62 = vcombine.low %v6817_v59, %v6829_v38  ;;  %v3979_v58 = vadd.f32 %v3978_v13, %v3977_v36  ;;  %v3994_v5 = vrot.slane %v3993_v23, 4 }
 0x268   :  { %v3985_v2 = vadd.f32 %v3984_v21, %v3749_v9  ;;  %v4075_v25 = vsub.f32 0.0, %v4043_v8  ;;  %v4077_v28 = vsub.f32 0.0, %v4045_v16  ;;  %v4074_v37 = vsub.f32 0.0, %v4042_v52 }
 0x269   :  { %v4001_v30 = vadd.f32 %v4000_v60, %v3751_v6  ;;  %v3980_v32 = vrot.slane %v3979_v58, 2  ;;  %v3995_v33 = vadd.f32 %v3994_v5, %v3993_v23  ;;  %v4076_v18 = vsub.f32 0.0, %v4044_v61 }
 0x26a   :  { %v3986_v35 = vrot.slane %v3985_v2, 4  ;;  %v4132_v48 = vmul.f32 1.442695, %v4075_v25  ;;  %v4136_v31 = vmul.f32 1.442695, %v4077_v28  ;;  %v4380_v4 = vrot.slane %v4372_v62, %v6572_v11 }
 0x26b   :  { %v4993_v20 = vpop.eup %4992  ;;  %v4002_v56 = vrot.slane %v4001_v30, 4  ;;  %v3981_v59 = vadd.f32 %v3980_v32, %v3979_v58  ;;  %v3996_v38 = vrot.slane %v3995_v33, 2  ;;  %v4130_v53 = vmul.f32 1.442695, %v4074_v37 }
 0x26c   :  { %v4995_v24 = vpop.eup %4994  ;;  %v3987_v57 = vadd.f32 %v3986_v35, %v3985_v2  ;;  %v4134_v46 = vmul.f32 1.442695, %v4076_v18  ;;  %5000 = vpow2.f32 %v4132_v48 }
 0x26d   :  { %v4997_v7 = vpop.eup %4996  ;;  %v4003_v40 = vadd.f32 %v4002_v56, %v4001_v30  ;;  %v3982_v49 = vrot.slane %v3981_v59, 1  ;;  %v3997_v51 = vadd.f32 %v3996_v38, %v3995_v33  ;;  %5002 = vpow2.f32 %v4136_v31 }
 0x26e   :  { %v4999_v26 = vpop.eup %4998  ;;  %v4342_v29 = vcombine.low %v4993_v20, %v4997_v7  ;;  %v3988_v47 = vrot.slane %v3987_v57, 2  ;;  %5004 = vpow2.f32 %v4130_v53 }
 0x26f   :  { %v4343_v39 = vcombine.low %v4995_v24, %v4999_v26  ;;  %v4004_v55 = vrot.slane %v4003_v40, 2  ;;  %v3983_v54 = vadd.f32 %v3982_v49, %v3981_v59  ;;  %v3998_v14 = vrot.slane %v3997_v51, 1 }
 0x270   :  { %v4364_v50 = vrot.slane %v4342_v29, %v6572_v11  ;;  %v3989_v19 = vadd.f32 %v3988_v47, %v3987_v57  ;;  %5006 = vpow2.f32 %v4134_v46 }
 0x271   :  { %v4371_v41 = vrot.slane %v4343_v39, %v6572_v11  ;;  %v4046_v63 = vadd.f32 %v6569_v10, %v3983_v54  ;;  %v4005_v0 = vadd.f32 %v4004_v55, %v4003_v40  ;;  %v3999_v44 = vadd.f32 %v3998_v14, %v3997_v51 }
 0x272   :  { %v3990_v22 = vrot.slane %v3989_v19, 1 }
 0x273   :  { %v4373_v27 = vcombine.low %v4364_v50, %v4371_v41  ;;  %v4078_v45 = vsub.f32 0.0, %v4046_v63  ;;  %v4006_v3 = vrot.slane %v4005_v0, 1  ;;  %v4048_v42 = vadd.f32 %v6569_v10, %v3999_v44 }
 0x274   :  { %v3991_v36 = vadd.f32 %v3990_v22, %v3989_v19 }
 0x275   :  { %v4387_v43 = vrot.slane %v4373_v27, %v6572_v11  ;;  %v4138_v34 = vmul.f32 1.442695, %v4078_v45  ;;  %v4007_v12 = vadd.f32 %v4006_v3, %v4005_v0  ;;  %v4080_v8 = vsub.f32 0.0, %v4048_v42 }
 0x276   :  { %v4047_v16 = vadd.f32 %v6569_v10, %v3991_v36 }
 0x277   :  { %v4388_v1 = vcombine.low %v4380_v4, %v4387_v43  ;;  %5008 = vpow2.f32 %v4138_v34  ;;  %v4049_v15 = vadd.f32 %v6569_v10, %v4007_v12  ;;  %v4142_v17 = vmul.f32 1.442695, %v4080_v8 }
 0x278   :  { %v4079_v20 = vsub.f32 0.0, %v4047_v16 }
 0x279   :  { %4444 = vst [vmem:[%s6878_s6 + $0x10] sm:$0xff] %v4388_v1  ;;  %v4081_v21 = vsub.f32 0.0, %v4049_v15  ;;  %5010 = vpow2.f32 %v4142_v17  ;;  %v5001_v9 = vpop.eup %5000 }
 0x27a   :  { %v4140_v13 = vmul.f32 1.442695, %v4079_v20  ;;  %v5003_v24 = vpop.eup %5002  ;;  %v4171_v60 = vadd.f32 1.0, %v5001_v9 }
 0x27b   :  { %v4144_v23 = vmul.f32 1.442695, %v4081_v21  ;;  %v5005_v52 = vpop.eup %5004  ;;  %v4173_v6 = vadd.f32 1.0, %v5003_v24 }
 0x27c   :  { %5012 = vpow2.f32 %v4140_v13  ;;  %v4170_v7 = vadd.f32 1.0, %v5005_v52 }
 0x27d   :  { %5014 = vpow2.f32 %v4144_v23  ;;  %v5007_v61 = vpop.eup %5006 }
 0x27e   :  { %v4172_v62 = vadd.f32 1.0, %v5007_v61  ;;  %5016 = vrcp.f32 %v4171_v60 }
 0x27f   :  { %5018 = vrcp.f32 %v4173_v6 }
 0x280   :  { %5020 = vrcp.f32 %v4170_v7 }
 0x281   :  { %5022 = vrcp.f32 %v4172_v62 }
 0x284   :  { %v5009_v58 = vpop.eup %5008 }
 0x285   :  { %v4174_v10 = vadd.f32 1.0, %v5009_v58 }
 0x286   :  { %v5011_v5 = vpop.eup %5010 }
 0x287   :  { %v4176_v2 = vadd.f32 1.0, %v5011_v5  ;;  %5024 = vrcp.f32 %v4174_v10 }
 0x289   :  { %v5013_v26 = vpop.eup %5012  ;;  %5026 = vrcp.f32 %v4176_v2 }
 0x28a   :  { %v5015_v29 = vpop.eup %5014  ;;  %v4175_v25 = vadd.f32 1.0, %v5013_v26 }
 0x28b   :  { %v4177_v28 = vadd.f32 1.0, %v5015_v29  ;;  %v5017_v30 = vpop.eup %5016 }
 0x28c   :  { %5028 = vrcp.f32 %v4175_v25  ;;  %v5019_v39 = vpop.eup %5018 }
 0x28d   :  { %5030 = vrcp.f32 %v4177_v28  ;;  %v5021_v32 = vpop.eup %5020 }
 0x28e   :  { %v5023_v33 = vpop.eup %5022  ;;  %v4389_v35 = vcombine.low %v5021_v32, %v5017_v30 }
 0x28f   :  { %v4390_v50 = vcombine.low %v5023_v33, %v5019_v39 }
 0x290   :  { %v4399_v41 = vrot.slane %v4389_v35, %v6572_v11 }
 0x291   :  { %v4406_v59 = vrot.slane %v4390_v50, %v6572_v11 }
 0x293   :  { %v4421_v27 = vcombine.low %v4399_v41, %v4406_v59 }
 0x294   :  { %v5025_v37 = vpop.eup %5024 }
 0x295   :  { %v4429_v51 = vrot.slane %v4421_v27, %v6572_v11 }
 0x296   :  { %v5027_v18 = vpop.eup %5026 }
 0x299   :  { %v5029_v56 = vpop.eup %5028 }
 0x29a   :  { %v5031_v38 = vpop.eup %5030  ;;  %v4391_v57 = vcombine.low %v5025_v37, %v5029_v56 }
 0x29b   :  { %v4392_v48 = vcombine.low %v5027_v18, %v5031_v38 }
 0x29c   :  { %v4413_v40 = vrot.slane %v4391_v57, %v6572_v11 }
 0x29d   :  { %v4420_v31 = vrot.slane %v4392_v48, %v6572_v11 }
 0x29f   :  { %v4422_v49 = vcombine.low %v4413_v40, %v4420_v31 }
 0x2a1   :  { %v4436_v53 = vrot.slane %v4422_v49, %v6572_v11 }
 0x2a3   :  { %v4437_v47 = vcombine.low %v4429_v51, %v4436_v53 }
 0x2a5   :  { %4445 = vst [vmem:[%s6878_s6 + $0x18] sm:$0xff] %v4437_v47 }

</bundles_post_ra>
